<compile_context>
chip_gen: v7x
topology: tpu7x:2x2x1
jax: 0.10.0
libtpu: 0.0.40
codegen_flags: <defaults>
</compile_context>

<pallas_src>
import jax
import jax.numpy as jnp
from jax.experimental import pallas as pl
from jax.experimental.pallas import tpu as pltpu

HIDDEN = 768
_VMEM_BUDGET_BYTES = 40 * 1024 * 1024  # conservative: leaves headroom on v7x's 64 MiB VMEM


def _mlp_kernel(x_ref, w1_ref, b1_ref, w2_ref, b2_ref, w3_ref, b3_ref, o_ref):
    # linear1: bf16 operands (cast in-kernel), f32 accumulation on the MXU, then ReLU.
    x_bf = x_ref[...].astype(jnp.bfloat16)
    h1 = jnp.dot(x_bf, w1_ref[...], preferred_element_type=jnp.float32)
    h1 = jnp.maximum(h1 + b1_ref[...], 0.0)

    # linear2 + dropout (identity in eval mode) + ReLU.
    h2 = jnp.dot(h1.astype(jnp.bfloat16), w2_ref[...],
                 preferred_element_type=jnp.float32)
    h2 = jnp.maximum(h2 + b2_ref[...], 0.0)

    # linear3: output width 1 -> VPU multiply + XLU lane reduction (avoids a padded
    # 1-column MXU matmul).  w3_ref is a (1, HIDDEN) f32 row.
    out = jnp.sum(h2 * w3_ref[...], axis=-1, keepdims=True) + b3_ref[...]
    o_ref[...] = out.astype(o_ref.dtype)


def _vmem_estimate_bytes(block_b, D):
    """Rough per-step VMEM footprint (inputs, single-buffered weights, f32 temporaries)."""
    x_tile = 2 * block_b * D * 4                    # double-buffered f32 input tile
    weights = D * HIDDEN * 2 + HIDDEN * HIDDEN * 2  # w1, w2 (bf16, single-buffered)
    smalls = 4 * HIDDEN * 4                         # b1, b2, w3 row, b3 (f32, padded)
    out_tile = 2 * block_b * 128 * 4                # double-buffered, lane-padded output
    temps = block_b * HIDDEN * (4 + 2 + 4 + 4)      # h1 f32 + h1 bf16 + h2 f32 + elemwise temp
    return x_tile + weights + smalls + out_tile + temps


def _pick_block_b(B, D):
    """Largest batch tile (multiple of 8, divides B) that fits the VMEM budget and, when
    B >= 16, leaves at least 2 grid steps so v7x's two TensorCores both get work."""
    if B % 8 != 0 or B < 8:
        raise ValueError(f"batch size {B} must be a positive multiple of 8")
    cap = 2048
    if B >= 16:
        cap = min(cap, B // 2)  # guarantee >= 2 grid steps for megacore sharding
    cap = min(cap, B)
    best = 8
    for blk in range(8, cap + 1, 8):
        if B % blk == 0 and _vmem_estimate_bytes(blk, D) <= _VMEM_BUDGET_BYTES:
            best = blk
    return best


def _const_block_spec(shape):
    """Constant-index BlockSpec for grid-invariant operands; single-buffered when supported."""
    index_map = lambda i: (0,) * len(shape)
    if hasattr(pl, "Buffered"):
        try:
            return pl.BlockSpec(shape, index_map, pipeline_mode=pl.Buffered(1))
        except TypeError:
            pass
    return pl.BlockSpec(shape, index_map)


def perceptron1class_forward(x, params, *, block_b=None):
    """x: [B, D] float32.  params: dict with w1,b1,w2,b2 ([in,out] layout, bf16 weights),
    w3 ([1,768] f32 row), b3 ([1,1] f32)."""
    B, D = x.shape
    if block_b is None:
        block_b = _pick_block_b(B, D)
    assert block_b % 8 == 0, "block_b must be a multiple of 8 (TPU sublane tiling)"
    assert B % block_b == 0, "batch must be divisible by block_b"

    x = x.astype(jnp.float32)            # kernel casts to bf16 internally
    w1 = params["w1"]                    # (D, HIDDEN) bf16, pre-cast in init_params
    w2 = params["w2"]                    # (HIDDEN, HIDDEN) bf16
    b1 = params["b1"]                    # (1, HIDDEN) f32
    b2 = params["b2"]                    # (1, HIDDEN) f32
    w3 = params["w3"]                    # (1, HIDDEN) f32 row
    b3 = params["b3"]                    # (1, 1) f32

    grid = (B // block_b,)

    flops = 2 * B * (D * HIDDEN + HIDDEN * HIDDEN + HIDDEN)
    bytes_accessed = (
        B * D * 4                                   # x (f32)
        + (D * HIDDEN + HIDDEN * HIDDEN) * 2        # w1, w2 (bf16)
        + (HIDDEN + HIDDEN + HIDDEN + 1) * 4        # b1, b2, w3 row, b3 (f32)
        + B * 4                                     # output (f32)
    )

    vmem_limit = min(max(32 * 1024 * 1024,
                         int(_vmem_estimate_bytes(block_b, D) * 1.2)),
                     56 * 1024 * 1024)              # cap: stays inside v7x's 64 MiB VMEM

    return pl.pallas_call(
        _mlp_kernel,
        out_shape=jax.ShapeDtypeStruct((B, 1), jnp.float32),
        grid_spec=pltpu.PrefetchScalarGridSpec(
            num_scalar_prefetch=0,
            grid=grid,
            in_specs=[
                pl.BlockSpec((block_b, D), lambda i: (i, 0)),  # x tile (pipelined)
                _const_block_spec((D, HIDDEN)),                # w1 (resident, single-buffered)
                _const_block_spec((1, HIDDEN)),                # b1
                _const_block_spec((HIDDEN, HIDDEN)),           # w2
                _const_block_spec((1, HIDDEN)),                # b2
                _const_block_spec((1, HIDDEN)),                # w3 row
                _const_block_spec((1, 1)),                     # b3
            ],
            out_specs=pl.BlockSpec((block_b, 1), lambda i: (i, 0)),
        ),
        compiler_params=pltpu.CompilerParams(
            dimension_semantics=("parallel",),
            vmem_limit_bytes=vmem_limit,
        ),
        cost_estimate=pl.CostEstimate(
            flops=flops, transcendentals=0, bytes_accessed=bytes_accessed
        ),
    )(x, w1, b1, w2, b2, w3, b3)


def init_params(key, input_dim):
    """Deterministic PyTorch-style init: U(-1/sqrt(fan_in), 1/sqrt(fan_in)).
    Weights are pre-cast once to their kernel dtypes (bf16 matmul operands, f32 small tensors)."""
    ks = jax.random.split(key, 6)

    def lin(kw, kb, fan_in, fan_out):
        bound = 1.0 / jnp.sqrt(fan_in)
        w = jax.random.uniform(kw, (fan_in, fan_out), jnp.float32, -bound, bound)
        b = jax.random.uniform(kb, (1, fan_out), jnp.float32, -bound, bound)
        return w, b

    w1, b1 = lin(ks[0], ks[1], input_dim, HIDDEN)
    w2, b2 = lin(ks[2], ks[3], HIDDEN, HIDDEN)
    w3_col, b3 = lin(ks[4], ks[5], HIDDEN, 1)
    return {
        "w1": w1.astype(jnp.bfloat16),
        "b1": b1.astype(jnp.float32),
        "w2": w2.astype(jnp.bfloat16),
        "b2": b2.astype(jnp.float32),
        "w3": w3_col.reshape(1, HIDDEN).astype(jnp.float32),  # lane-dense row for the VPU path
        "b3": b3.astype(jnp.float32),                          # (1, 1)
    }


def _reference(x, p):
    """Pure-JAX reference with matching bf16-operand / f32-accumulation numerics."""
    xb = x.astype(jnp.bfloat16)
    h1 = jnp.maximum(
        jnp.dot(xb, p["w1"], preferred_element_type=jnp.float32) + p["b1"], 0.0)
    h2 = jnp.maximum(
        jnp.dot(h1.astype(jnp.bfloat16), p["w2"], preferred_element_type=jnp.float32)
        + p["b2"], 0.0)
    return jnp.sum(h2 * p["w3"], axis=-1, keepdims=True) + p["b3"]


if __name__ == "__main__":
    key = jax.random.PRNGKey(0)
    k_x, k_p = jax.random.split(key)

    B, INPUT_DIM = 8, 32  # small shapes consistent with Linear(input_dim, 768)
    x = jax.random.normal(k_x, (B, INPUT_DIM), jnp.float32)
    params = init_params(k_p, INPUT_DIM)

    out = perceptron1class_forward(x, params)
    out = jax.block_until_ready(out)

    ref = _reference(x, params)
    assert out.shape == (B, 1)
    assert jnp.allclose(out, ref, atol=1e-2, rtol=1e-2), "mismatch vs reference"

    print("KERNEL_OK")
</pallas_src>

<mosaic_0001>
module attributes {stable_mosaic.version = 11 : i64} {
  func.func @_mlp_kernel(%arg0: i32, %arg1: memref<8x32xf32, #tpu.memory_space<vmem>>, %arg2: memref<32x768xbf16, #tpu.memory_space<vmem>>, %arg3: memref<1x768xf32, #tpu.memory_space<vmem>>, %arg4: memref<768x768xbf16, #tpu.memory_space<vmem>>, %arg5: memref<1x768xf32, #tpu.memory_space<vmem>>, %arg6: memref<1x768xf32, #tpu.memory_space<vmem>>, %arg7: memref<1x1xf32, #tpu.memory_space<vmem>>, %arg8: memref<8x1xf32, #tpu.memory_space<vmem>>) attributes {dimension_semantics = [#tpu.dimension_semantics<parallel>], iteration_bounds = array<i64: 1>, scalar_prefetch = 0 : i64, scratch_operands = 0 : i64, tpu.core_type = #tpu.core_type<tc>, window_params = [{transform_indices = @transform_0, window_bounds = array<i64: 8, 32>}, {pipeline_mode = #tpu.pipeline_mode<synchronous>, transform_indices = @transform_1, window_bounds = array<i64: 32, 768>}, {pipeline_mode = #tpu.pipeline_mode<synchronous>, transform_indices = @transform_2, window_bounds = array<i64: 1, 768>}, {pipeline_mode = #tpu.pipeline_mode<synchronous>, transform_indices = @transform_3, window_bounds = array<i64: 768, 768>}, {pipeline_mode = #tpu.pipeline_mode<synchronous>, transform_indices = @transform_4, window_bounds = array<i64: 1, 768>}, {pipeline_mode = #tpu.pipeline_mode<synchronous>, transform_indices = @transform_5, window_bounds = array<i64: 1, 768>}, {pipeline_mode = #tpu.pipeline_mode<synchronous>, transform_indices = @transform_6, window_bounds = array<i64: 1, 1>}, {transform_indices = @transform_7, window_bounds = array<i64: 8, 1>}]} {
    %c0 = arith.constant 0 : index
    %c0_0 = arith.constant 0 : index
    %0 = vector.load %arg1[%c0, %c0_0] : memref<8x32xf32, #tpu.memory_space<vmem>>, vector<8x32xf32>
    %1 = arith.truncf %0 : vector<8x32xf32> to vector<8x32xbf16>
    %c0_1 = arith.constant 0 : index
    %c0_2 = arith.constant 0 : index
    %2 = vector.load %arg2[%c0_1, %c0_2] : memref<32x768xbf16, #tpu.memory_space<vmem>>, vector<32x768xbf16>
    %cst = arith.constant dense<0.000000e+00> : vector<8x768xf32>
    %3 = tpu.matmul %1, %2, %cst {dimension_numbers = #tpu.dot_dimension_numbers<[1], [0], [0], [1], [0, 0, 1, 1], [], []>} : vector<8x32xbf16>, vector<32x768xbf16>, vector<8x768xf32> -> vector<8x768xf32>
    %c0_3 = arith.constant 0 : index
    %c0_4 = arith.constant 0 : index
    %4 = vector.load %arg3[%c0_3, %c0_4] : memref<1x768xf32, #tpu.memory_space<vmem>>, vector<1x768xf32>
    %5 = vector.broadcast %4 : vector<1x768xf32> to vector<8x768xf32>
    %6 = arith.addf %3, %5 : vector<8x768xf32>
    %cst_5 = arith.constant 0.000000e+00 : f32
    %7 = vector.broadcast %cst_5 : f32 to vector<8x768xf32>
    %8 = arith.maximumf %6, %7 : vector<8x768xf32>
    %9 = arith.truncf %8 : vector<8x768xf32> to vector<8x768xbf16>
    %c0_6 = arith.constant 0 : index
    %c0_7 = arith.constant 0 : index
    %10 = vector.load %arg4[%c0_6, %c0_7] : memref<768x768xbf16, #tpu.memory_space<vmem>>, vector<768x768xbf16>
    %cst_8 = arith.constant dense<0.000000e+00> : vector<8x768xf32>
    %11 = tpu.matmul %9, %10, %cst_8 {dimension_numbers = #tpu.dot_dimension_numbers<[1], [0], [0], [1], [0, 0, 1, 1], [], []>} : vector<8x768xbf16>, vector<768x768xbf16>, vector<8x768xf32> -> vector<8x768xf32>
    %c0_9 = arith.constant 0 : index
    %c0_10 = arith.constant 0 : index
    %12 = vector.load %arg5[%c0_9, %c0_10] : memref<1x768xf32, #tpu.memory_space<vmem>>, vector<1x768xf32>
    %13 = vector.broadcast %12 : vector<1x768xf32> to vector<8x768xf32>
    %14 = arith.addf %11, %13 : vector<8x768xf32>
    %cst_11 = arith.constant 0.000000e+00 : f32
    %15 = vector.broadcast %cst_11 : f32 to vector<8x768xf32>
    %16 = arith.maximumf %14, %15 : vector<8x768xf32>
    %c0_12 = arith.constant 0 : index
    %c0_13 = arith.constant 0 : index
    %17 = vector.load %arg6[%c0_12, %c0_13] : memref<1x768xf32, #tpu.memory_space<vmem>>, vector<1x768xf32>
    %18 = vector.broadcast %17 : vector<1x768xf32> to vector<8x768xf32>
    %19 = arith.mulf %16, %18 : vector<8x768xf32>
    %cst_14 = arith.constant dense<0.000000e+00> : vector<8xf32>
    %20 = vector.multi_reduction <add>, %19, %cst_14 [1] : vector<8x768xf32> to vector<8xf32>
    %21 = vector.shape_cast %20 : vector<8xf32> to vector<8x1xf32>
    %c0_15 = arith.constant 0 : index
    %c0_16 = arith.constant 0 : index
    %22 = vector.load %arg7[%c0_15, %c0_16] : memref<1x1xf32, #tpu.memory_space<vmem>>, vector<1x1xf32>
    %23 = vector.broadcast %22 : vector<1x1xf32> to vector<8x1xf32>
    %24 = arith.addf %21, %23 : vector<8x1xf32>
    %c0_17 = arith.constant 0 : index
    %c0_18 = arith.constant 0 : index
    %25 = vector.load %arg8[%c0_17, %c0_18] : memref<8x1xf32, #tpu.memory_space<vmem>>, vector<8x1xf32>
    tpu.vector_store %arg8[%c0_17, %c0_18], %24 {strides = array<i32>} : memref<8x1xf32, #tpu.memory_space<vmem>>, vector<8x1xf32>,
    return
  }
  func.func @transform_0(%arg0: i32) -> (i32, i32) {
    %c0_i32 = arith.constant 0 : i32
    %c0_i32_0 = arith.constant 0 : i32
    return %arg0, %c0_i32 : i32, i32
  }
  func.func @transform_1(%arg0: i32) -> (i32, i32) {
    %c0_i32 = arith.constant 0 : i32
    %c0_i32_0 = arith.constant 0 : i32
    %c0_i32_1 = arith.constant 0 : i32
    return %c0_i32, %c0_i32_0 : i32, i32
  }
  func.func @transform_2(%arg0: i32) -> (i32, i32) {
    %c0_i32 = arith.constant 0 : i32
    %c0_i32_0 = arith.constant 0 : i32
    %c0_i32_1 = arith.constant 0 : i32
    return %c0_i32, %c0_i32_0 : i32, i32
  }
  func.func @transform_3(%arg0: i32) -> (i32, i32) {
    %c0_i32 = arith.constant 0 : i32
    %c0_i32_0 = arith.constant 0 : i32
    %c0_i32_1 = arith.constant 0 : i32
    return %c0_i32, %c0_i32_0 : i32, i32
  }
  func.func @transform_4(%arg0: i32) -> (i32, i32) {
    %c0_i32 = arith.constant 0 : i32
    %c0_i32_0 = arith.constant 0 : i32
    %c0_i32_1 = arith.constant 0 : i32
    return %c0_i32, %c0_i32_0 : i32, i32
  }
  func.func @transform_5(%arg0: i32) -> (i32, i32) {
    %c0_i32 = arith.constant 0 : i32
    %c0_i32_0 = arith.constant 0 : i32
    %c0_i32_1 = arith.constant 0 : i32
    return %c0_i32, %c0_i32_0 : i32, i32
  }
  func.func @transform_6(%arg0: i32) -> (i32, i32) {
    %c0_i32 = arith.constant 0 : i32
    %c0_i32_0 = arith.constant 0 : i32
    %c0_i32_1 = arith.constant 0 : i32
    return %c0_i32, %c0_i32_0 : i32, i32
  }
  func.func @transform_7(%arg0: i32) -> (i32, i32) {
    %c0_i32 = arith.constant 0 : i32
    %c0_i32_0 = arith.constant 0 : i32
    return %arg0, %c0_i32 : i32, i32
  }
}

</mosaic_0001>

<bundles_post_ra>
// kernel: tpu_custom_call.1
= control target key start
LH: loop header
LB: loop body
LE: loop exit
PB: predicated region body
PF: predicated region fallthrough
CT: control target
= control target key end

     0   :  { %s3686_s0 = inlined_call_operand.hbm [shape: f32[8,32], index: 0, kind: input, shape index: {}]   ;;  %s3687_s1 = inlined_call_operand.hbm [shape: bf16[32,768], index: 1, kind: input, shape index: {}]   ;;  %s3688_s2 = inlined_call_operand.hbm [shape: f32[1,768], index: 2, kind: input, shape index: {}]   ;;  %s3689_s3 = inlined_call_operand.hbm [shape: bf16[768,768], index: 3, kind: input, shape index: {}]   ;;  %s3690_s4 = inlined_call_operand.hbm [shape: f32[1,768], index: 4, kind: input, shape index: {}]   ;;  %s3691_s5 = inlined_call_operand.hbm [shape: f32[1,768], index: 5, kind: input, shape index: {}]   ;;  %s3692_s6 = inlined_call_operand.<no memory space> [shape: f32[1,1], index: 6, kind: input, shape index: {}]   ;;  %s3693_s7 = inlined_call_operand.vmem [shape: f32[8,1], index: 7, kind: output, shape index: {}]  }
   0x1   :  { %v12_v0 = vstv %s3692_s6 }
   0x2   :  { %13 = vst [vmem:[#allocation2] sm:$0x1] %v12_v0 }
   0x3   :  { %14 = vsyncpa [#allocation4], 0 }
   0x4   :  { %15 = vsyncpa [#allocation6], 0 }
   0x5   :  { %16 = vsyncpa [#allocation9], 0 }
   0x6   :  { %17 = vsyncpa [#allocation12], 0  ;;  %s3477_s26 = smov [#allocation5]   ;;  %s3337_s30 = scalar_lea.hbm %s3687_s1, 1536 }
   0x7   :  { %s33_s27 = sshll.u32 %s3477_s26, 4  ;;  %p3338_p0 = scmp.ne.s32.totalorder %s3687_s1, %s3337_s30  ;;  %s34_s27 = int_to_ptr.vmem [resolvable:$true] %s33_s27 }
   0x8   :  { %p3341_p1 = scmp.lt.u32.totalorder %s3337_s30, %s3687_s1 }
   0xa   :  { %p3343_p2 = pnand %p3341_p1, %p3338_p0 }
   0xc   :  { %3346 = shalt.err (!%p3343_p2)
}
   0xd   :  { %s3347_s6 = scalar_lea.vmem %s34_s27, 1536  ;;  %p3352_p4 = scmp.lt.s32.totalorder %s34_s27, %s34_s27 }
   0xe   :  { %p3348_p3 = scmp.ne.s32.totalorder %s34_s27, %s3347_s6  ;;  %p3353_p5 = scmp.lt.s32.totalorder %s3347_s6, %s3347_s6 }
  0x10   :  { %p3354_p6 = por %p3353_p5, %p3352_p4 }
  0x12   :  { %p3355_p7 = pnand %p3354_p6, %p3348_p3 }
  0x14   :  { %3358 = shalt.err (!%p3355_p7)
}
  0x15   :  { %s3478_s12 = smov 384   ;;  %s3479_s13 = smov 24  }
  0x16   :  { %39 = dma.hbm_to_vmem [thread:$0]  %s3687_s1, 1536, %s34_s27, [#allocation6], %s3478_s12, %s3478_s12, %s3479_s13  }
  0x17   :  { %s3480_s16 = smov [#allocation8]   ;;  %s3481_s18 = smov [#allocation3]  }
  0x18   :  { %s55_s17 = sshll.u32 %s3480_s16, 4  ;;  %s24_s19 = sshll.u32 %s3481_s18, 4  ;;  %s56_s17 = int_to_ptr.vmem [resolvable:$true] %s55_s17  ;;  %s25_s19 = int_to_ptr.vmem [resolvable:$true] %s24_s19 }
  0x19   :  { %s3359_s22 = scalar_lea.hbm %s3689_s3, 36864 }
  0x1a   :  { %p3360_p8 = scmp.ne.s32.totalorder %s3689_s3, %s3359_s22  ;;  %p3363_p9 = scmp.lt.u32.totalorder %s3359_s22, %s3689_s3 }
  0x1c   :  { %p3365_p10 = pnand %p3363_p9, %p3360_p8 }
  0x1e   :  { %3368 = shalt.err (!%p3365_p10)
}
  0x1f   :  { %s3369_s1 = scalar_lea.vmem %s56_s17, 36864  ;;  %p3374_p12 = scmp.lt.s32.totalorder %s56_s17, %s56_s17 }
  0x20   :  { %p3370_p11 = scmp.ne.s32.totalorder %s56_s17, %s3369_s1  ;;  %p3375_p13 = scmp.lt.s32.totalorder %s3369_s1, %s3369_s1 }
  0x22   :  { %p3376_p0 = por %p3375_p13, %p3374_p12 }
  0x24   :  { %p3377_p1 = pnand %p3376_p0, %p3370_p11 }
  0x26   :  { %3380 = shalt.err (!%p3377_p1)
}
  0x27   :  { %61 = dma.hbm_to_vmem [thread:$0]  %s3689_s3, 36864, %s56_s17, [#allocation9], %s3478_s12, %s3478_s12, %s3479_s13  }
  0x28   :  { %s3381_s8 = scalar_lea.hbm %s3686_s0, 128 }
  0x29   :  { %p3382_p2 = scmp.ne.s32.totalorder %s3686_s0, %s3381_s8  ;;  %p3385_p3 = scmp.lt.u32.totalorder %s3381_s8, %s3686_s0 }
  0x2b   :  { %p3387_p4 = pnand %p3385_p3, %p3382_p2 }
  0x2d   :  { %3390 = shalt.err (!%p3387_p4)
}
  0x2e   :  { %s3391_s14 = scalar_lea.vmem %s25_s19, 128  ;;  %p3396_p6 = scmp.lt.s32.totalorder %s25_s19, %s25_s19 }
  0x2f   :  { %p3392_p5 = scmp.ne.s32.totalorder %s25_s19, %s3391_s14  ;;  %p3397_p7 = scmp.lt.s32.totalorder %s3391_s14, %s3391_s14 }
  0x31   :  { %p3398_p8 = por %p3397_p7, %p3396_p6 }
  0x33   :  { %p3399_p9 = pnand %p3398_p8, %p3392_p5 }
  0x35   :  { %3402 = shalt.err (!%p3399_p9)
}
  0x36   :  { %27 = dma.hbm_to_vmem [thread:$0]  %s3686_s0, 128, %s25_s19, [#allocation4]  }
  0x37   :  { %s3482_s13 = smov [#allocation7]   ;;  %s3483_s16 = smov [#allocation10]  }
  0x38   :  { %s46_s15 = sshll.u32 %s3482_s13, 4  ;;  %s68_s17 = sshll.u32 %s3483_s16, 4  ;;  %s47_s15 = int_to_ptr.vmem [resolvable:$true] %s46_s15  ;;  %s69_s17 = int_to_ptr.vmem [resolvable:$true] %s68_s17 }
  0x39   :  { %s3403_s21 = scalar_lea.hbm %s3688_s2, 96 }
  0x3a   :  { %p3404_p10 = scmp.ne.s32.totalorder %s3688_s2, %s3403_s21  ;;  %p3407_p11 = scmp.lt.u32.totalorder %s3403_s21, %s3688_s2 }
  0x3c   :  { %p3409_p12 = pnand %p3407_p11, %p3404_p10 }
  0x3e   :  { %3412 = shalt.err (!%p3409_p12)
}
  0x3f   :  { %s3413_s0 = scalar_lea.vmem %s47_s15, 96  ;;  %p3418_p0 = scmp.lt.s32.totalorder %s47_s15, %s47_s15 }
  0x40   :  { %p3414_p13 = scmp.ne.s32.totalorder %s47_s15, %s3413_s0  ;;  %p3419_p1 = scmp.lt.s32.totalorder %s3413_s0, %s3413_s0 }
  0x42   :  { %p3420_p2 = por %p3419_p1, %p3418_p0 }
  0x44   :  { %p3421_p3 = pnand %p3420_p2, %p3414_p13 }
  0x46   :  { %3424 = shalt.err (!%p3421_p3)
}
  0x47   :  { %49 = dma.hbm_to_vmem [thread:$0]  %s3688_s2, 96, %s47_s15, [#allocation6]  }
  0x48   :  { %s3425_s28 = scalar_lea.hbm %s3690_s4, 96 }
  0x49   :  { %p3426_p4 = scmp.ne.s32.totalorder %s3690_s4, %s3425_s28  ;;  %p3429_p5 = scmp.lt.u32.totalorder %s3425_s28, %s3690_s4 }
  0x4b   :  { %p3431_p6 = pnand %p3429_p5, %p3426_p4 }
  0x4d   :  { %3434 = shalt.err (!%p3431_p6)
}
  0x4e   :  { %s3435_s10 = scalar_lea.vmem %s69_s17, 96  ;;  %p3440_p8 = scmp.lt.s32.totalorder %s69_s17, %s69_s17 }
  0x4f   :  { %p3436_p7 = scmp.ne.s32.totalorder %s69_s17, %s3435_s10  ;;  %p3441_p9 = scmp.lt.s32.totalorder %s3435_s10, %s3435_s10 }
  0x51   :  { %p3442_p10 = por %p3441_p9, %p3440_p8 }
  0x53   :  { %p3443_p11 = pnand %p3442_p10, %p3436_p7 }
  0x55   :  { %3446 = shalt.err (!%p3443_p11)
}
  0x56   :  { %71 = dma.hbm_to_vmem [thread:$0]  %s3690_s4, 96, %s69_s17, [#allocation9]  }
  0x57   :  { %s3484_s6 = smov [#allocation11]   ;;  %s3447_s13 = scalar_lea.hbm %s3691_s5, 96 }
  0x58   :  { %s78_s14 = sshll.u32 %s3484_s6, 4  ;;  %p3448_p12 = scmp.ne.s32.totalorder %s3691_s5, %s3447_s13  ;;  %s79_s14 = int_to_ptr.vmem [resolvable:$true] %s78_s14 }
  0x59   :  { %p3451_p13 = scmp.lt.u32.totalorder %s3447_s13, %s3691_s5 }
  0x5b   :  { %p3453_p0 = pnand %p3451_p13, %p3448_p12 }
  0x5d   :  { %3456 = shalt.err (!%p3453_p0)
}
  0x5e   :  { %s3457_s21 = scalar_lea.vmem %s79_s14, 96  ;;  %p3462_p2 = scmp.lt.s32.totalorder %s79_s14, %s79_s14 }
  0x5f   :  { %p3458_p1 = scmp.ne.s32.totalorder %s79_s14, %s3457_s21  ;;  %p3463_p3 = scmp.lt.s32.totalorder %s3457_s21, %s3457_s21 }
  0x61   :  { %p3464_p4 = por %p3463_p3, %p3462_p2 }
  0x63   :  { %p3465_p5 = pnand %p3464_p4, %p3458_p1 }
  0x65   :  { %3468 = shalt.err (!%p3465_p5)
}
  0x66   :  { %81 = dma.hbm_to_vmem [thread:$0]  %s3691_s5, 96, %s79_s14, [#allocation12]  }
  0x67   :  { %3469 = dma.done.wait [#allocation4], 128  }
  0x68   :  { %3470 = vsyncadd [#allocation4], 4294967168 }
  0x69   :  { %3471 = dma.done.wait [#allocation6], 1632  }
  0x6a   :  { %3472 = vsyncadd [#allocation6], 4294965664 }
  0x6b   :  { %3473 = dma.done.wait [#allocation9], 36960  }
  0x6c   :  { %3474 = vsyncadd [#allocation9], 4294930336 }
  0x6d   :  { %3475 = dma.done.wait [#allocation12], 96  }
  0x6e   :  { %3476 = vsyncadd [#allocation12], 4294967200  ;;  %v3485_v1 = vmov 0   ;;  %v2887_v2 = vld [vmem:[#allocation5 + $0x4] ss:$24 sps:$4 sm:$0xff]   ;;  %vm209_vm0 = vcmask 261120  }
  0x6f   :  { %245 = vmatprep.mubr.bf16.mxu0 %v3485_v1  ;;  %v2889_v3 = vld [vmem:[#allocation5] ss:$24 sps:$4 sm:$0xff]   ;;  %213 = vmatprep.subr.bf16.mxu0 %v2887_v2  ;;  %v2890_v4 = vld [vmem:[#allocation5 + $0x34] ss:$24 sps:$4 sm:$0xff]   ;;  %v2892_v5 = vld [vmem:[#allocation5 + $0x30] ss:$24 sps:$4 sm:$0xff]  }
  0x70   :  { %214 = vmatpush1.bf16.msra.mxu0 %v2889_v3  ;;  %v103_v6 = vld [vmem:[#allocation3] sm:$0xff]  ;;  %v2895_v7 = vld [vmem:[#allocation5 + $0xc] ss:$24 sps:$4 sm:$0xff]   ;;  %v2893_v9 = vld [vmem:[#allocation5 + $0x8] ss:$24 sps:$4 sm:$0xff]   ;;  %vm2536_vm1 = vcmask 7168  }
  0x71   :  { %215 = vmatprep.subr.bf16.mxu0 %v2890_v4  ;;  %v104_v8 = vpack.c.bf16 %v103_v6, %v103_v6  ;;  %v2898_v10 = vld [vmem:[#allocation5 + $0x3c] ss:$24 sps:$4 sm:$0xff]   ;;  %v2896_v11 = vld [vmem:[#allocation5 + $0x38] ss:$24 sps:$4 sm:$0xff]   ;;  %v2914_v13 = vld [vmem:[#allocation8 + $0x304] ss:$24 sps:$4 sm:$0xff]  }
  0x72   :  { %v2901_v12 = vld [vmem:[#allocation5 + $0x14] ss:$24 sps:$4 sm:$0xff]   ;;  %v2916_v14 = vld [vmem:[#allocation8 + $0x300] ss:$24 sps:$4 sm:$0xff]   ;;  %2149 = vmatprep.subr.bf16.mxu1 %v2914_v13 }
  0x73   :  { %v2899_v15 = vld [vmem:[#allocation5 + $0x10] ss:$24 sps:$4 sm:$0xff]   ;;  %v2904_v16 = vld [vmem:[#allocation5 + $0x44] ss:$24 sps:$4 sm:$0xff]   ;;  %2150 = vmatpush1.bf16.msra.mxu1 %v2916_v14  ;;  %v2902_v19 = vld [vmem:[#allocation5 + $0x40] ss:$24 sps:$4 sm:$0xff]  }
  0x74   :  { %216 = vmatpush1.bf16.msra.mxu0 %v2892_v5  ;;  %v2920_v17 = vld [vmem:[#allocation8 + $0x334] ss:$24 sps:$4 sm:$0xff]   ;;  %v2922_v18 = vld [vmem:[#allocation8 + $0x330] ss:$24 sps:$4 sm:$0xff]   ;;  %v2926_v20 = vld [vmem:[#allocation8 + $0x364] ss:$24 sps:$4 sm:$0xff]  }
  0x75   :  { %254 = vmatprep.subr.bf16.mxu0 %v2895_v7  ;;  %2151 = vmatprep.subr.bf16.mxu1 %v2920_v17  ;;  %v2907_v21 = vld [vmem:[#allocation8 + $0x4] ss:$24 sps:$4 sm:$0xff]   ;;  %v2928_v22 = vld [vmem:[#allocation8 + $0x360] ss:$24 sps:$4 sm:$0xff]   ;;  %v2932_v23 = vld [vmem:[#allocation8 + $0x394] ss:$24 sps:$4 sm:$0xff]  }
  0x76   :  { %v2905_v24 = vld [vmem:[#allocation8] ss:$24 sps:$4 sm:$0xff]   ;;  %v2910_v25 = vld [vmem:[#allocation8 + $0x34] ss:$24 sps:$4 sm:$0xff]   ;;  %v2934_v26 = vld [vmem:[#allocation8 + $0x390] ss:$24 sps:$4 sm:$0xff]  }
  0x77   :  { %2558 = vmatmul.mubr.msk.bf16.vlgmr.msra.gmra.mrb[0].mxu0 %vm209_vm0, %v104_v8  ;;  %2152 = vmatpush1.bf16.msra.mxu1 %v2922_v18  ;;  %v2938_v27 = vld [vmem:[#allocation8 + $0x3c4] ss:$24 sps:$4 sm:$0xff]   ;;  %v2908_v28 = vld [vmem:[#allocation8 + $0x30] ss:$24 sps:$4 sm:$0xff]   ;;  %v2940_v30 = vld [vmem:[#allocation8 + $0x3c0] ss:$24 sps:$4 sm:$0xff]   ;;  %v119_v18 = vlaneseq }
  0x78   :  { %255 = vmatpush1.bf16.msra.mxu0 %v2893_v9  ;;  %286 = vmatprep.mubr.bf16.mxu0 %v3485_v1  ;;  %v2913_v29 = vld [vmem:[#allocation8 + $0x64] ss:$24 sps:$4 sm:$0xff]   ;;  %v2944_v31 = vld [vmem:[#allocation8 + $0x3f4] ss:$24 sps:$4 sm:$0xff]   ;;  %v2911_v32 = vld [vmem:[#allocation8 + $0x60] ss:$24 sps:$4 sm:$0xff]  }
  0x79   :  { %256 = vmatprep.subr.bf16.mxu0 %v2898_v10  ;;  %2153 = vmatprep.subr.bf16.mxu1 %v2926_v20  ;;  %v2919_v33 = vld [vmem:[#allocation8 + $0x94] ss:$24 sps:$4 sm:$0xff]   ;;  %v2946_v34 = vld [vmem:[#allocation8 + $0x3f0] ss:$24 sps:$4 sm:$0xff]   ;;  %v2950_v35 = vld [vmem:[#allocation8 + $0x424] ss:$24 sps:$4 sm:$0xff]  }
  0x7a   :  { %v2917_v36 = vld [vmem:[#allocation8 + $0x90] ss:$24 sps:$4 sm:$0xff]   ;;  %v2925_v37 = vld [vmem:[#allocation8 + $0xc4] ss:$24 sps:$4 sm:$0xff]   ;;  %v2952_v38 = vld [vmem:[#allocation8 + $0x420] ss:$24 sps:$4 sm:$0xff]  }
  0x7b   :  { %2154 = vmatpush1.bf16.msra.mxu1 %v2928_v22  ;;  %v2956_v39 = vld [vmem:[#allocation8 + $0x454] ss:$24 sps:$4 sm:$0xff]   ;;  %v2923_v40 = vld [vmem:[#allocation8 + $0xc0] ss:$24 sps:$4 sm:$0xff]   ;;  %v2958_v42 = vld [vmem:[#allocation8 + $0x450] ss:$24 sps:$4 sm:$0xff]  }
  0x7c   :  { %257 = vmatpush1.bf16.msra.mxu0 %v2896_v11  ;;  %2155 = vmatprep.subr.bf16.mxu1 %v2932_v23  ;;  %v2931_v41 = vld [vmem:[#allocation8 + $0xf4] ss:$24 sps:$4 sm:$0xff]   ;;  %v2929_v43 = vld [vmem:[#allocation8 + $0xf0] ss:$24 sps:$4 sm:$0xff]   ;;  %v2962_v44 = vld [vmem:[#allocation8 + $0x484] ss:$24 sps:$4 sm:$0xff]  }
  0x7d   :  { %295 = vmatprep.subr.bf16.mxu0 %v2901_v12  ;;  %v2937_v45 = vld [vmem:[#allocation8 + $0x124] ss:$24 sps:$4 sm:$0xff]   ;;  %v2964_v46 = vld [vmem:[#allocation8 + $0x480] ss:$24 sps:$4 sm:$0xff]   ;;  %v2968_v47 = vld [vmem:[#allocation8 + $0x4b4] ss:$24 sps:$4 sm:$0xff]  }
  0x7e   :  { %v2935_v48 = vld [vmem:[#allocation8 + $0x120] ss:$24 sps:$4 sm:$0xff]   ;;  %v2943_v49 = vld [vmem:[#allocation8 + $0x154] ss:$24 sps:$4 sm:$0xff]   ;;  %v2970_v50 = vld [vmem:[#allocation8 + $0x4b0] ss:$24 sps:$4 sm:$0xff]  }
  0x7f   :  { %2559 = vmatmul.mubr.msk.bf16.vlgmr.msra.gmra.mrb[4].mxu0 %vm209_vm0, %v104_v8  ;;  %2156 = vmatpush1.bf16.msra.mxu1 %v2934_v26  ;;  %v2974_v51 = vld [vmem:[#allocation8 + $0x4e4] ss:$24 sps:$4 sm:$0xff]   ;;  %v2941_v52 = vld [vmem:[#allocation8 + $0x150] ss:$24 sps:$4 sm:$0xff]   ;;  %v2976_v54 = vld [vmem:[#allocation8 + $0x4e0] ss:$24 sps:$4 sm:$0xff]  }
  0x80   :  { %296 = vmatpush1.bf16.msra.mxu0 %v2899_v15  ;;  %327 = vmatprep.mubr.bf16.mxu0 %v3485_v1  ;;  %v2949_v53 = vld [vmem:[#allocation8 + $0x184] ss:$24 sps:$4 sm:$0xff]   ;;  %v2980_v55 = vld [vmem:[#allocation8 + $0x514] ss:$24 sps:$4 sm:$0xff]   ;;  %v2947_v56 = vld [vmem:[#allocation8 + $0x180] ss:$24 sps:$4 sm:$0xff]  }
  0x81   :  { %297 = vmatprep.subr.bf16.mxu0 %v2904_v16  ;;  %2157 = vmatprep.subr.bf16.mxu1 %v2938_v27  ;;  %v2955_v57 = vld [vmem:[#allocation8 + $0x1b4] ss:$24 sps:$4 sm:$0xff]   ;;  %v2982_v58 = vld [vmem:[#allocation8 + $0x510] ss:$24 sps:$4 sm:$0xff]   ;;  %v2961_v60 = vld [vmem:[#allocation8 + $0x1e4] ss:$24 sps:$4 sm:$0xff]  }
  0x82   :  { %v2953_v59 = vld [vmem:[#allocation8 + $0x1b0] ss:$24 sps:$4 sm:$0xff]   ;;  %v2959_v61 = vld [vmem:[#allocation8 + $0x1e0] ss:$24 sps:$4 sm:$0xff]   ;;  %v2967_v62 = vld [vmem:[#allocation8 + $0x214] ss:$24 sps:$4 sm:$0xff]  }
  0x83   :  { %2158 = vmatpush1.bf16.msra.mxu1 %v2940_v30  ;;  %v2965_v63 = vld [vmem:[#allocation8 + $0x210] ss:$24 sps:$4 sm:$0xff]   ;;  %v2973_v0 = vld [vmem:[#allocation8 + $0x244] ss:$24 sps:$4 sm:$0xff]   ;;  %v2971_v1 = vld [vmem:[#allocation8 + $0x240] ss:$24 sps:$4 sm:$0xff]  }
  0x84   :  { %298 = vmatpush1.bf16.msra.mxu0 %v2902_v19  ;;  %2159 = vmatprep.subr.bf16.mxu1 %v2944_v31  ;;  %v2979_v2 = vld [vmem:[#allocation8 + $0x274] ss:$24 sps:$4 sm:$0xff]   ;;  %v2977_v3 = vld [vmem:[#allocation8 + $0x270] ss:$24 sps:$4 sm:$0xff]   ;;  %v2985_v4 = vld [vmem:[#allocation8 + $0x2a4] ss:$24 sps:$4 sm:$0xff]  }
  0x85   :  { %2108 = vmatprep.subr.bf16.mxu0 %v2907_v21  ;;  %v2986_v5 = vld [vmem:[#allocation8 + $0x544] ss:$24 sps:$4 sm:$0xff]   ;;  %v2983_v6 = vld [vmem:[#allocation8 + $0x2a0] ss:$24 sps:$4 sm:$0xff]   ;;  %v2992_v9 = vld [vmem:[#allocation8 + $0x574] ss:$24 sps:$4 sm:$0xff]  }
  0x86   :  { %v2988_v7 = vld [vmem:[#allocation8 + $0x540] ss:$24 sps:$4 sm:$0xff]   ;;  %v2989_v10 = vld [vmem:[#allocation8 + $0x2d0] ss:$24 sps:$4 sm:$0xff]   ;;  %v2995_v12 = vld [vmem:[#allocation8 + $0x5a4] ss:$24 sps:$4 sm:$0xff]  }
  0x87   :  { %2560 = vmatmul.mubr.msk.bf16.vlgmr.msra.gmra.mrb[8].mxu0 %vm209_vm0, %v104_v8  ;;  %2160 = vmatpush1.bf16.msra.mxu1 %v2946_v34  ;;  %v2991_v8 = vld [vmem:[#allocation8 + $0x2d4] ss:$24 sps:$4 sm:$0xff]   ;;  %v2994_v11 = vld [vmem:[#allocation8 + $0x570] ss:$24 sps:$4 sm:$0xff]   ;;  %v3000_v14 = vld [vmem:[#allocation8 + $0x5a0] ss:$24 sps:$4 sm:$0xff]  }
  0x88   :  { %2109 = vmatpush1.bf16.msra.mxu0 %v2905_v24  ;;  %2161 = vmatprep.subr.bf16.mxu1 %v2950_v35  ;;  %v2999_v13 = vld [vmem:[#allocation8 + $0xc] ss:$24 sps:$4 sm:$0xff]   ;;  %v3006_v16 = vld [vmem:[#allocation8 + $0x5d0] ss:$24 sps:$4 sm:$0xff]   ;;  %v3604_v19 = vshrl.u32 %v119_v18, 7 }
  0x89   :  { %2110 = vmatprep.subr.bf16.mxu0 %v2910_v25  ;;  %v3001_v15 = vld [vmem:[#allocation8 + $0x5d4] ss:$24 sps:$4 sm:$0xff]   ;;  %v3009_v17 = vld [vmem:[#allocation8 + $0x604] ss:$24 sps:$4 sm:$0xff]   ;;  %v3037_v18 = vld [vmem:[#allocation8 + $0x6f0] ss:$24 sps:$4 sm:$0xff]  }
  0x8a   :  { %v3607_v20 = vsub.s32 0, %v3604_v19  ;;  %v3609_v21 = vld [vmem:[#allocation7] sm:$0x3f]  ;;  %v3612_v22 = vsub.s32 1, %v3604_v19  ;;  %v3622_v31 = vsub.s32 3, %v3604_v19 }
  0x8b   :  { %2162 = vmatpush1.bf16.msra.mxu1 %v2952_v38 }
  0x8c   :  { %2111 = vmatpush1.bf16.msra.mxu0 %v2908_v28  ;;  %2163 = vmatprep.subr.bf16.mxu1 %v2956_v39  ;;  %v122_v23 = vrot.slane %v3609_v21, %v3607_v20  ;;  %v126_v24 = vrot.slane %v3609_v21, %v3612_v22  ;;  %v3619_v28 = vsub.s32 2, %v3604_v19  ;;  %v134_v38 = vrot.slane %v3609_v21, %v3622_v31 }
  0x8d   :  { %2112 = vmatprep.subr.bf16.mxu0 %v2913_v29 }
  0x8e   :  { %v130_v35 = vrot.slane %v3609_v21, %v3619_v28 }
  0x8f   :  { %2164 = vmatpush1.bf16.msra.mxu1 %v2958_v42 }
  0x90   :  { %2113 = vmatpush1.bf16.msra.mxu0 %v2911_v32  ;;  %2165 = vmatprep.subr.bf16.mxu1 %v2962_v44 }
  0x91   :  { %2114 = vmatprep.subr.bf16.mxu0 %v2919_v33 }
  0x93   :  { %2166 = vmatpush1.bf16.msra.mxu1 %v2964_v46  ;;  %v3003_v46 = vld [vmem:[#allocation8 + $0x38] ss:$24 sps:$4 sm:$0xff]  }
  0x94   :  { %2115 = vmatpush1.bf16.msra.mxu0 %v2917_v36  ;;  %2167 = vmatprep.subr.bf16.mxu1 %v2968_v47  ;;  %v3636_v47 = vsub.s32 5, %v3604_v19 }
  0x95   :  { %2116 = vmatprep.subr.bf16.mxu0 %v2925_v37  ;;  %v2997_v37 = vld [vmem:[#allocation8 + $0x8] ss:$24 sps:$4 sm:$0xff]  }
  0x97   :  { %2168 = vmatpush1.bf16.msra.mxu1 %v2970_v50  ;;  %v3012_v50 = vld [vmem:[#allocation8 + $0x6c] ss:$24 sps:$4 sm:$0xff]  }
  0x98   :  { %2117 = vmatpush1.bf16.msra.mxu0 %v2923_v40  ;;  %2169 = vmatprep.subr.bf16.mxu1 %v2974_v51  ;;  %v3005_v40 = vld [vmem:[#allocation8 + $0x3c] ss:$24 sps:$4 sm:$0xff]  }
  0x99   :  { %2118 = vmatprep.subr.bf16.mxu0 %v2931_v41 }
  0x9b   :  { %2170 = vmatpush1.bf16.msra.mxu1 %v2976_v54  ;;  %v3010_v54 = vld [vmem:[#allocation8 + $0x68] ss:$24 sps:$4 sm:$0xff]  }
  0x9c   :  { %2119 = vmatpush1.bf16.msra.mxu0 %v2929_v43  ;;  %2171 = vmatprep.subr.bf16.mxu1 %v2980_v55  ;;  %v142_v55 = vrot.slane %v3609_v21, %v3636_v47 }
  0x9d   :  { %2120 = vmatprep.subr.bf16.mxu0 %v2937_v45 }
  0x9f   :  { %2172 = vmatpush1.bf16.msra.mxu1 %v2982_v58  ;;  %v3018_v58 = vld [vmem:[#allocation8 + $0x9c] ss:$24 sps:$4 sm:$0xff]  }
  0xa0   :  { %2121 = vmatpush1.bf16.msra.mxu0 %v2935_v48  ;;  %2173 = vmatprep.subr.bf16.mxu1 %v2986_v5  ;;  %v3019_v5 = vld [vmem:[#allocation8 + $0x660] ss:$24 sps:$4 sm:$0xff]  }
  0xa1   :  { %2122 = vmatprep.subr.bf16.mxu0 %v2943_v49 }
  0xa3   :  { %2174 = vmatpush1.bf16.msra.mxu1 %v2988_v7 }
  0xa4   :  { %2123 = vmatpush1.bf16.msra.mxu0 %v2941_v52  ;;  %2175 = vmatprep.subr.bf16.mxu1 %v2992_v9  ;;  %v3030_v9 = vld [vmem:[#allocation8 + $0xfc] ss:$24 sps:$4 sm:$0xff]  }
  0xa5   :  { %2124 = vmatprep.subr.bf16.mxu0 %v2949_v53  ;;  %v3007_v53 = vld [vmem:[#allocation8 + $0x600] ss:$24 sps:$4 sm:$0xff]  }
  0xa7   :  { %2176 = vmatpush1.bf16.msra.mxu1 %v2994_v11  ;;  %v3028_v11 = vld [vmem:[#allocation8 + $0xf8] ss:$24 sps:$4 sm:$0xff]  }
  0xa8   :  { %2125 = vmatpush1.bf16.msra.mxu0 %v2947_v56  ;;  %2177 = vmatprep.subr.bf16.mxu1 %v2995_v12  ;;  %v3033_v12 = vld [vmem:[#allocation8 + $0x6c4] ss:$24 sps:$4 sm:$0xff]  }
  0xa9   :  { %2126 = vmatprep.subr.bf16.mxu0 %v2955_v57  ;;  %v3015_v57 = vld [vmem:[#allocation8 + $0x634] ss:$24 sps:$4 sm:$0xff]  }
  0xab   :  { %2178 = vmatpush1.bf16.msra.mxu1 %v3000_v14  ;;  %v3031_v14 = vld [vmem:[#allocation8 + $0x6c0] ss:$24 sps:$4 sm:$0xff]  }
  0xac   :  { %2127 = vmatpush1.bf16.msra.mxu0 %v2953_v59  ;;  %2179 = vmatprep.subr.bf16.mxu1 %v3001_v15  ;;  %v3034_v15 = vld [vmem:[#allocation8 + $0x128] ss:$24 sps:$4 sm:$0xff]  }
  0xad   :  { %2128 = vmatprep.subr.bf16.mxu0 %v2961_v60 }
  0xaf   :  { %2180 = vmatpush1.bf16.msra.mxu1 %v3006_v16  ;;  %v3039_v16 = vld [vmem:[#allocation8 + $0x6f4] ss:$24 sps:$4 sm:$0xff]  }
  0xb0   :  { %2129 = vmatpush1.bf16.msra.mxu0 %v2959_v61  ;;  %2190 = vmatprep.subr.bf16.mxu1 %v3009_v17  ;;  %v3013_v61 = vld [vmem:[#allocation8 + $0x630] ss:$24 sps:$4 sm:$0xff]   ;;  %v3042_v17 = vld [vmem:[#allocation8 + $0x15c] ss:$24 sps:$4 sm:$0xff]  }
  0xb1   :  { %2130 = vmatprep.subr.bf16.mxu0 %v2967_v62  ;;  %v3016_v62 = vld [vmem:[#allocation8 + $0x98] ss:$24 sps:$4 sm:$0xff]  }
  0xb4   :  { %2131 = vmatpush1.bf16.msra.mxu0 %v2965_v63 }
  0xb5   :  { %2132 = vmatprep.subr.bf16.mxu0 %v2973_v0 }
  0xb8   :  { %2133 = vmatpush1.bf16.msra.mxu0 %v2971_v1  ;;  %v3021_v1 = vld [vmem:[#allocation8 + $0x664] ss:$24 sps:$4 sm:$0xff]  }
  0xb9   :  { %2134 = vmatprep.subr.bf16.mxu0 %v2979_v2  ;;  %v3024_v2 = vld [vmem:[#allocation8 + $0xcc] ss:$24 sps:$4 sm:$0xff]  }
  0xbc   :  { %2135 = vmatpush1.bf16.msra.mxu0 %v2977_v3 }
  0xbd   :  { %2136 = vmatprep.subr.bf16.mxu0 %v2985_v4 }
  0xc0   :  { %2137 = vmatpush1.bf16.msra.mxu0 %v2983_v6  ;;  %v3022_v6 = vld [vmem:[#allocation8 + $0xc8] ss:$24 sps:$4 sm:$0xff]  }
  0xc1   :  { %2138 = vmatprep.subr.bf16.mxu0 %v2991_v8  ;;  %v3027_v8 = vld [vmem:[#allocation8 + $0x694] ss:$24 sps:$4 sm:$0xff]  }
  0xc4   :  { %2139 = vmatpush1.bf16.msra.mxu0 %v2989_v10  ;;  %v3025_v10 = vld [vmem:[#allocation8 + $0x690] ss:$24 sps:$4 sm:$0xff]  }
  0xc5   :  { %2231 = vmatprep.subr.bf16.mxu0 %v2999_v13  ;;  %v3036_v13 = vld [vmem:[#allocation8 + $0x12c] ss:$24 sps:$4 sm:$0xff]  }
 0x14a   :  { %v247_v25 = vpop.f32.mrb[0].mxu0 }
 0x14b   :  { %v248_v26 = vadd.f32 %v247_v25, %v122_v23  ;;  %v249_v27 = vpop.f32.mrb[1].mxu0  ;;  %v3040_v23 = vld [vmem:[#allocation8 + $0x158] ss:$24 sps:$4 sm:$0xff]   ;;  %v3048_v25 = vld [vmem:[#allocation8 + $0x18c] ss:$24 sps:$4 sm:$0xff]  }
 0x14c   :  { %v250_v29 = vadd.f32 %v249_v27, %v126_v24  ;;  %v251_v30 = vpop.f32.mrb[2].mxu0  ;;  %v3045_v24 = vld [vmem:[#allocation8 + $0x724] ss:$24 sps:$4 sm:$0xff]   ;;  %v3046_v27 = vld [vmem:[#allocation8 + $0x188] ss:$24 sps:$4 sm:$0xff]  }
 0x14d   :  { %v336_v32 = vmax.f32 %v248_v26, 0.0  ;;  %v252_v33 = vpop.f32.mrb[3].mxu0  ;;  %v3043_v26 = vld [vmem:[#allocation8 + $0x720] ss:$24 sps:$4 sm:$0xff]   ;;  %v3054_v30 = vld [vmem:[#allocation8 + $0x1bc] ss:$24 sps:$4 sm:$0xff]  }
 0x14e   :  { %v337_v34 = vmax.f32 %v250_v29, 0.0  ;;  %v3051_v29 = vld [vmem:[#allocation8 + $0x754] ss:$24 sps:$4 sm:$0xff]   ;;  %v3052_v33 = vld [vmem:[#allocation8 + $0x1b8] ss:$24 sps:$4 sm:$0xff]  }
 0x14f   :  { %v3630_v39 = vpack.c.bf16 %v336_v32, %v336_v32  ;;  %v3049_v32 = vld [vmem:[#allocation8 + $0x750] ss:$24 sps:$4 sm:$0xff]  }
 0x150   :  { %v3626_v36 = vpack.c.bf16 %v337_v34, %v337_v34  ;;  %v3057_v34 = vld [vmem:[#allocation8 + $0x784] ss:$24 sps:$4 sm:$0xff]  }
 0x152   :  { %v288_v41 = vpop.f32.mrb[4].mxu0  ;;  %2140 = vmatprep.mubr.bf16.mxu0 %v3626_v36 }
 0x153   :  { %v289_v42 = vadd.f32 %v288_v41, %v130_v35  ;;  %v290_v43 = vpop.f32.mrb[5].mxu0  ;;  %2141 = vmatmul.mubr.bf16.vlgmr.msra.gmra.mrb[12].mxu0 %v3630_v39  ;;  %v3060_v35 = vld [vmem:[#allocation8 + $0x1ec] ss:$24 sps:$4 sm:$0xff]   ;;  %v3066_v41 = vld [vmem:[#allocation8 + $0x21c] ss:$24 sps:$4 sm:$0xff]  }
 0x154   :  { %v291_v44 = vadd.f32 %v290_v43, %v134_v38  ;;  %2232 = vmatpush1.bf16.msra.mxu0 %v2997_v37  ;;  %v292_v45 = vpop.f32.mrb[6].mxu0  ;;  %2263 = vmatprep.mubr.bf16.mxu0 %v3626_v36  ;;  %v3055_v37 = vld [vmem:[#allocation8 + $0x780] ss:$24 sps:$4 sm:$0xff]  }
 0x155   :  { %v338_v48 = vmax.f32 %v289_v42, 0.0  ;;  %v293_v49 = vpop.f32.mrb[7].mxu0  ;;  %2233 = vmatprep.subr.bf16.mxu0 %v3005_v40  ;;  %v3058_v38 = vld [vmem:[#allocation8 + $0x1e8] ss:$24 sps:$4 sm:$0xff]   ;;  %v3063_v40 = vld [vmem:[#allocation8 + $0x7b4] ss:$24 sps:$4 sm:$0xff]  }
 0x156   :  { %v339_v51 = vmax.f32 %v291_v44, 0.0  ;;  %v3061_v42 = vld [vmem:[#allocation8 + $0x7b0] ss:$24 sps:$4 sm:$0xff]   ;;  %v3069_v44 = vld [vmem:[#allocation8 + $0x7e4] ss:$24 sps:$4 sm:$0xff]  }
 0x157   :  { %v3642_v56 = vpack.c.bf16 %v338_v48, %v338_v48  ;;  %v3064_v43 = vld [vmem:[#allocation8 + $0x218] ss:$24 sps:$4 sm:$0xff]   ;;  %v3072_v45 = vld [vmem:[#allocation8 + $0x24c] ss:$24 sps:$4 sm:$0xff]   ;;  %v3070_v48 = vld [vmem:[#allocation8 + $0x248] ss:$24 sps:$4 sm:$0xff]  }
 0x158   :  { %v3638_v52 = vpack.c.bf16 %v339_v51, %v339_v51  ;;  %2234 = vmatpush1.bf16.msra.mxu0 %v3003_v46  ;;  %v3067_v46 = vld [vmem:[#allocation8 + $0x7e0] ss:$24 sps:$4 sm:$0xff]   ;;  %v3075_v49 = vld [vmem:[#allocation8 + $0x814] ss:$24 sps:$4 sm:$0xff]   ;;  %v3073_v51 = vld [vmem:[#allocation8 + $0x810] ss:$24 sps:$4 sm:$0xff]  }
 0x159   :  { %2235 = vmatprep.subr.bf16.mxu0 %v3012_v50  ;;  %v3078_v50 = vld [vmem:[#allocation8 + $0x27c] ss:$24 sps:$4 sm:$0xff]  }
 0x15a   :  { %2181 = vmatprep.mubr.bf16.mxu1 %v3638_v52  ;;  %v3645_v59 = vpop.f32.mrb[8].mxu0 }
 0x15b   :  { %2182 = vmatmul.mubr.bf16.vlgmr.msra.gmra.mrb[0].mxu1 %v3642_v56  ;;  %v331_v60 = vpop.f32.mrb[9].mxu0 }
 0x15c   :  { %2191 = vmatpush1.bf16.msra.mxu1 %v3007_v53  ;;  %2236 = vmatpush1.bf16.msra.mxu0 %v3010_v54  ;;  %v332_v63 = vadd.f32 %v331_v60, %v142_v55  ;;  %v333_v0 = vpop.f32.mrb[10].mxu0  ;;  %v3076_v53 = vld [vmem:[#allocation8 + $0x278] ss:$24 sps:$4 sm:$0xff]   ;;  %v3081_v54 = vld [vmem:[#allocation8 + $0x844] ss:$24 sps:$4 sm:$0xff]  }
 0x15d   :  { %2192 = vmatprep.subr.bf16.mxu1 %v3015_v57  ;;  %2237 = vmatprep.subr.bf16.mxu0 %v3018_v58  ;;  %v334_v3 = vpop.f32.mrb[11].mxu0  ;;  %v3084_v55 = vld [vmem:[#allocation8 + $0x2ac] ss:$24 sps:$4 sm:$0xff]   ;;  %v3652_v57 = vsub.s32 4, %v3604_v19  ;;  %v3079_v58 = vld [vmem:[#allocation8 + $0x840] ss:$24 sps:$4 sm:$0xff]  }
 0x15e   :  { %v341_v4 = vmax.f32 %v332_v63, 0.0  ;;  %v3082_v60 = vld [vmem:[#allocation8 + $0x2a8] ss:$24 sps:$4 sm:$0xff]   ;;  %v3096_v19 = vld [vmem:[#allocation8 + $0x30c] ss:$24 sps:$4 sm:$0xff]  }
 0x15f   :  { %v138_v63 = vrot.slane %v3609_v21, %v3652_v57  ;;  %v3085_v0 = vld [vmem:[#allocation8 + $0x870] ss:$24 sps:$4 sm:$0xff]  }
 0x160   :  { %2193 = vmatpush1.bf16.msra.mxu1 %v3013_v61  ;;  %2238 = vmatpush1.bf16.msra.mxu0 %v3016_v62  ;;  %v3648_v7 = vpack.c.bf16 %v341_v4, %v341_v4  ;;  %v3087_v61 = vld [vmem:[#allocation8 + $0x874] ss:$24 sps:$4 sm:$0xff]   ;;  %v3091_v4 = vld [vmem:[#allocation8 + $0x8a0] ss:$24 sps:$4 sm:$0xff]   ;;  %v3097_v21 = vld [vmem:[#allocation8 + $0x8d0] ss:$24 sps:$4 sm:$0xff]  }
 0x161   :  { %2194 = vmatprep.subr.bf16.mxu1 %v3021_v1  ;;  %2239 = vmatprep.subr.bf16.mxu0 %v3024_v2  ;;  %v3090_v62 = vld [vmem:[#allocation8 + $0x2dc] ss:$24 sps:$4 sm:$0xff]   ;;  %v3088_v1 = vld [vmem:[#allocation8 + $0x2d8] ss:$24 sps:$4 sm:$0xff]   ;;  %v330_v3 = vadd.f32 %v3645_v59, %v138_v63  ;;  %v3165_v63 = vld [vmem:[#allocation8 + $0x54c] ss:$24 sps:$4 sm:$0xff]  }
 0x162   :  { %2222 = vmatprep.mubr.bf16.mxu1 %v3648_v7  ;;  %v3093_v2 = vld [vmem:[#allocation8 + $0x8a4] ss:$24 sps:$4 sm:$0xff]   ;;  %v3108_v59 = vld [vmem:[#allocation8 + $0x14] ss:$24 sps:$4 sm:$0xff]  }
 0x164   :  { %2195 = vmatpush1.bf16.msra.mxu1 %v3019_v5  ;;  %2240 = vmatpush1.bf16.msra.mxu0 %v3022_v6  ;;  %v3094_v5 = vld [vmem:[#allocation8 + $0x308] ss:$24 sps:$4 sm:$0xff]   ;;  %v3099_v6 = vld [vmem:[#allocation8 + $0x8d4] ss:$24 sps:$4 sm:$0xff]  }
 0x165   :  { %2196 = vmatprep.subr.bf16.mxu1 %v3027_v8  ;;  %2241 = vmatprep.subr.bf16.mxu0 %v3030_v9  ;;  %v3102_v8 = vld [vmem:[#allocation8 + $0x33c] ss:$24 sps:$4 sm:$0xff]   ;;  %v340_v9 = vmax.f32 %v330_v3, 0.0 }
 0x166   :  { %v3174_v3 = vld [vmem:[#allocation8 + $0x224] ss:$24 sps:$4 sm:$0xff]  }
 0x168   :  { %2197 = vmatpush1.bf16.msra.mxu1 %v3025_v10  ;;  %2242 = vmatpush1.bf16.msra.mxu0 %v3028_v11  ;;  %v3100_v10 = vld [vmem:[#allocation8 + $0x338] ss:$24 sps:$4 sm:$0xff]   ;;  %v3105_v11 = vld [vmem:[#allocation8 + $0x36c] ss:$24 sps:$4 sm:$0xff]  }
 0x169   :  { %2198 = vmatprep.subr.bf16.mxu1 %v3033_v12  ;;  %2243 = vmatprep.subr.bf16.mxu0 %v3036_v13  ;;  %v3659_v12 = vpack.c.bf16 %v340_v9, %v340_v9  ;;  %v3103_v13 = vld [vmem:[#allocation8 + $0x368] ss:$24 sps:$4 sm:$0xff]  }
 0x16a   :  { %v3175_v9 = vld [vmem:[#allocation8 + $0x5a8] ss:$24 sps:$4 sm:$0xff]  }
 0x16c   :  { %2199 = vmatpush1.bf16.msra.mxu1 %v3031_v14  ;;  %2244 = vmatpush1.bf16.msra.mxu0 %v3034_v15  ;;  %v3106_v14 = vld [vmem:[#allocation8 + $0x10] ss:$24 sps:$4 sm:$0xff]   ;;  %v3111_v15 = vld [vmem:[#allocation8 + $0x39c] ss:$24 sps:$4 sm:$0xff]  }
 0x16d   :  { %2200 = vmatprep.subr.bf16.mxu1 %v3039_v16  ;;  %2245 = vmatprep.subr.bf16.mxu0 %v3042_v17  ;;  %v3114_v16 = vld [vmem:[#allocation8 + $0x44] ss:$24 sps:$4 sm:$0xff]   ;;  %v3109_v17 = vld [vmem:[#allocation8 + $0x398] ss:$24 sps:$4 sm:$0xff]  }
 0x170   :  { %2201 = vmatpush1.bf16.msra.mxu1 %v3037_v18  ;;  %2246 = vmatpush1.bf16.msra.mxu0 %v3040_v23  ;;  %v3112_v18 = vld [vmem:[#allocation8 + $0x40] ss:$24 sps:$4 sm:$0xff]   ;;  %v3117_v23 = vld [vmem:[#allocation8 + $0x3cc] ss:$24 sps:$4 sm:$0xff]  }
 0x171   :  { %2202 = vmatprep.subr.bf16.mxu1 %v3045_v24  ;;  %2247 = vmatprep.subr.bf16.mxu0 %v3048_v25  ;;  %v3120_v24 = vld [vmem:[#allocation8 + $0x74] ss:$24 sps:$4 sm:$0xff]   ;;  %v3115_v25 = vld [vmem:[#allocation8 + $0x3c8] ss:$24 sps:$4 sm:$0xff]  }
 0x174   :  { %2203 = vmatpush1.bf16.msra.mxu1 %v3043_v26  ;;  %2248 = vmatpush1.bf16.msra.mxu0 %v3046_v27  ;;  %v3118_v26 = vld [vmem:[#allocation8 + $0x70] ss:$24 sps:$4 sm:$0xff]   ;;  %v3123_v27 = vld [vmem:[#allocation8 + $0x3fc] ss:$24 sps:$4 sm:$0xff]  }
 0x175   :  { %2204 = vmatprep.subr.bf16.mxu1 %v3051_v29  ;;  %2249 = vmatprep.subr.bf16.mxu0 %v3054_v30  ;;  %v3126_v29 = vld [vmem:[#allocation8 + $0xa4] ss:$24 sps:$4 sm:$0xff]   ;;  %v3121_v30 = vld [vmem:[#allocation8 + $0x3f8] ss:$24 sps:$4 sm:$0xff]  }
 0x178   :  { %2205 = vmatpush1.bf16.msra.mxu1 %v3049_v32  ;;  %2250 = vmatpush1.bf16.msra.mxu0 %v3052_v33  ;;  %v3124_v32 = vld [vmem:[#allocation8 + $0xa0] ss:$24 sps:$4 sm:$0xff]   ;;  %v3129_v33 = vld [vmem:[#allocation8 + $0x42c] ss:$24 sps:$4 sm:$0xff]  }
 0x179   :  { %2206 = vmatprep.subr.bf16.mxu1 %v3057_v34  ;;  %2251 = vmatprep.subr.bf16.mxu0 %v3060_v35  ;;  %v3127_v34 = vld [vmem:[#allocation8 + $0x428] ss:$24 sps:$4 sm:$0xff]  }
 0x17a   :  { %v3130_v35 = vld [vmem:[#allocation8 + $0xd0] ss:$24 sps:$4 sm:$0xff]  }
 0x17c   :  { %2207 = vmatpush1.bf16.msra.mxu1 %v3055_v37  ;;  %2252 = vmatpush1.bf16.msra.mxu0 %v3058_v38  ;;  %v3135_v37 = vld [vmem:[#allocation8 + $0x45c] ss:$24 sps:$4 sm:$0xff]  }
 0x17d   :  { %2208 = vmatprep.subr.bf16.mxu1 %v3063_v40  ;;  %2253 = vmatprep.subr.bf16.mxu0 %v3066_v41  ;;  %v3138_v38 = vld [vmem:[#allocation8 + $0x104] ss:$24 sps:$4 sm:$0xff]   ;;  %v3133_v40 = vld [vmem:[#allocation8 + $0x458] ss:$24 sps:$4 sm:$0xff]  }
 0x17e   :  { %v3136_v41 = vld [vmem:[#allocation8 + $0x100] ss:$24 sps:$4 sm:$0xff]  }
 0x180   :  { %2209 = vmatpush1.bf16.msra.mxu1 %v3061_v42  ;;  %2254 = vmatpush1.bf16.msra.mxu0 %v3064_v43  ;;  %v3141_v42 = vld [vmem:[#allocation8 + $0x48c] ss:$24 sps:$4 sm:$0xff]  }
 0x181   :  { %2210 = vmatprep.subr.bf16.mxu1 %v3069_v44  ;;  %2255 = vmatprep.subr.bf16.mxu0 %v3072_v45  ;;  %v3144_v43 = vld [vmem:[#allocation8 + $0x134] ss:$24 sps:$4 sm:$0xff]   ;;  %v3139_v44 = vld [vmem:[#allocation8 + $0x488] ss:$24 sps:$4 sm:$0xff]  }
 0x182   :  { %v3142_v45 = vld [vmem:[#allocation8 + $0x130] ss:$24 sps:$4 sm:$0xff]  }
 0x184   :  { %2211 = vmatpush1.bf16.msra.mxu1 %v3067_v46  ;;  %2256 = vmatpush1.bf16.msra.mxu0 %v3070_v48  ;;  %v3147_v46 = vld [vmem:[#allocation8 + $0x4bc] ss:$24 sps:$4 sm:$0xff]  }
 0x185   :  { %2212 = vmatprep.subr.bf16.mxu1 %v3075_v49  ;;  %2257 = vmatprep.subr.bf16.mxu0 %v3078_v50  ;;  %v3150_v48 = vld [vmem:[#allocation8 + $0x164] ss:$24 sps:$4 sm:$0xff]   ;;  %v3145_v49 = vld [vmem:[#allocation8 + $0x4b8] ss:$24 sps:$4 sm:$0xff]  }
 0x186   :  { %v3148_v50 = vld [vmem:[#allocation8 + $0x160] ss:$24 sps:$4 sm:$0xff]  }
 0x188   :  { %2213 = vmatpush1.bf16.msra.mxu1 %v3073_v51  ;;  %2258 = vmatpush1.bf16.msra.mxu0 %v3076_v53  ;;  %v3153_v51 = vld [vmem:[#allocation8 + $0x4ec] ss:$24 sps:$4 sm:$0xff]  }
 0x189   :  { %2214 = vmatprep.subr.bf16.mxu1 %v3081_v54  ;;  %2259 = vmatprep.subr.bf16.mxu0 %v3084_v55  ;;  %v3156_v53 = vld [vmem:[#allocation8 + $0x194] ss:$24 sps:$4 sm:$0xff]   ;;  %v3151_v54 = vld [vmem:[#allocation8 + $0x4e8] ss:$24 sps:$4 sm:$0xff]  }
 0x18a   :  { %v3154_v55 = vld [vmem:[#allocation8 + $0x190] ss:$24 sps:$4 sm:$0xff]  }
 0x18c   :  { %2215 = vmatpush1.bf16.msra.mxu1 %v3079_v58  ;;  %2260 = vmatpush1.bf16.msra.mxu0 %v3082_v60  ;;  %v3159_v58 = vld [vmem:[#allocation8 + $0x51c] ss:$24 sps:$4 sm:$0xff]  }
 0x18d   :  { %2216 = vmatprep.subr.bf16.mxu1 %v3087_v61  ;;  %2261 = vmatprep.subr.bf16.mxu0 %v3090_v62  ;;  %v3162_v60 = vld [vmem:[#allocation8 + $0x1c4] ss:$24 sps:$4 sm:$0xff]   ;;  %v3157_v61 = vld [vmem:[#allocation8 + $0x518] ss:$24 sps:$4 sm:$0xff]  }
 0x18e   :  { %v3160_v62 = vld [vmem:[#allocation8 + $0x1c0] ss:$24 sps:$4 sm:$0xff]  }
 0x190   :  { %2217 = vmatpush1.bf16.msra.mxu1 %v3085_v0  ;;  %2262 = vmatpush1.bf16.msra.mxu0 %v3088_v1  ;;  %v3168_v0 = vld [vmem:[#allocation8 + $0x1f4] ss:$24 sps:$4 sm:$0xff]   ;;  %v3163_v1 = vld [vmem:[#allocation8 + $0x548] ss:$24 sps:$4 sm:$0xff]  }
 0x191   :  { %2218 = vmatprep.subr.bf16.mxu1 %v3093_v2  ;;  %2272 = vmatprep.subr.bf16.mxu0 %v3096_v19  ;;  %v3166_v2 = vld [vmem:[#allocation8 + $0x1f0] ss:$24 sps:$4 sm:$0xff]   ;;  %v3171_v19 = vld [vmem:[#allocation8 + $0x57c] ss:$24 sps:$4 sm:$0xff]  }
 0x193   :  { %2264 = vmatmul.mubr.bf16.vlgmr.msra.gmra.mrb[16].mxu0 %v3630_v39 }
 0x194   :  { %2219 = vmatpush1.bf16.msra.mxu1 %v3091_v4  ;;  %2273 = vmatpush1.bf16.msra.mxu0 %v3094_v5  ;;  %v3169_v4 = vld [vmem:[#allocation8 + $0x578] ss:$24 sps:$4 sm:$0xff]  }
 0x195   :  { %2304 = vmatprep.mubr.bf16.mxu0 %v3638_v52  ;;  %2220 = vmatprep.subr.bf16.mxu1 %v3099_v6  ;;  %v3172_v5 = vld [vmem:[#allocation8 + $0x220] ss:$24 sps:$4 sm:$0xff]   ;;  %v3177_v6 = vld [vmem:[#allocation8 + $0x5ac] ss:$24 sps:$4 sm:$0xff]  }
 0x196   :  { %2274 = vmatprep.subr.bf16.mxu0 %v3102_v8  ;;  %v3180_v8 = vld [vmem:[#allocation8 + $0x254] ss:$24 sps:$4 sm:$0xff]  }
 0x198   :  { %2221 = vmatpush1.bf16.msra.mxu1 %v3097_v21  ;;  %2275 = vmatpush1.bf16.msra.mxu0 %v3100_v10  ;;  %v3178_v21 = vld [vmem:[#allocation8 + $0x250] ss:$24 sps:$4 sm:$0xff]   ;;  %v3183_v10 = vld [vmem:[#allocation8 + $0x5dc] ss:$24 sps:$4 sm:$0xff]  }
 0x199   :  { %2276 = vmatprep.subr.bf16.mxu0 %v3105_v11  ;;  %2354 = vmatprep.subr.bf16.mxu1 %v3108_v59  ;;  %v3186_v11 = vld [vmem:[#allocation8 + $0x284] ss:$24 sps:$4 sm:$0xff]   ;;  %v3181_v59 = vld [vmem:[#allocation8 + $0x5d8] ss:$24 sps:$4 sm:$0xff]  }
 0x19b   :  { %2223 = vmatmul.mubr.bf16.vlgmr.msra.gmra.mrb[0].mxu1 %v3659_v12 }
 0x19c   :  { %2277 = vmatpush1.bf16.msra.mxu0 %v3103_v13  ;;  %2355 = vmatpush1.bf16.msra.mxu1 %v3106_v14  ;;  %v3184_v13 = vld [vmem:[#allocation8 + $0x280] ss:$24 sps:$4 sm:$0xff]   ;;  %v3189_v14 = vld [vmem:[#allocation8 + $0x60c] ss:$24 sps:$4 sm:$0xff]  }
 0x19d   :  { %2386 = vmatprep.mubr.bf16.mxu1 %v3626_v36  ;;  %2278 = vmatprep.subr.bf16.mxu0 %v3111_v15  ;;  %v3132_v36 = vld [vmem:[#allocation8 + $0xd4] ss:$24 sps:$4 sm:$0xff]  }
 0x19e   :  { %2356 = vmatprep.subr.bf16.mxu1 %v3114_v16  ;;  %v3192_v15 = vld [vmem:[#allocation8 + $0x2b4] ss:$24 sps:$4 sm:$0xff]   ;;  %v3187_v16 = vld [vmem:[#allocation8 + $0x608] ss:$24 sps:$4 sm:$0xff]  }
 0x1a0   :  { %2279 = vmatpush1.bf16.msra.mxu0 %v3109_v17  ;;  %2357 = vmatpush1.bf16.msra.mxu1 %v3112_v18  ;;  %v3190_v17 = vld [vmem:[#allocation8 + $0x2b0] ss:$24 sps:$4 sm:$0xff]   ;;  %v3195_v18 = vld [vmem:[#allocation8 + $0x63c] ss:$24 sps:$4 sm:$0xff]  }
 0x1a1   :  { %2280 = vmatprep.subr.bf16.mxu0 %v3117_v23  ;;  %2358 = vmatprep.subr.bf16.mxu1 %v3120_v24  ;;  %v3198_v23 = vld [vmem:[#allocation8 + $0x2e4] ss:$24 sps:$4 sm:$0xff]   ;;  %v3193_v24 = vld [vmem:[#allocation8 + $0x638] ss:$24 sps:$4 sm:$0xff]  }
 0x1a4   :  { %2281 = vmatpush1.bf16.msra.mxu0 %v3115_v25  ;;  %2359 = vmatpush1.bf16.msra.mxu1 %v3118_v26  ;;  %v3196_v25 = vld [vmem:[#allocation8 + $0x2e0] ss:$24 sps:$4 sm:$0xff]   ;;  %v3201_v26 = vld [vmem:[#allocation8 + $0x66c] ss:$24 sps:$4 sm:$0xff]  }
 0x1a5   :  { %2282 = vmatprep.subr.bf16.mxu0 %v3123_v27  ;;  %2360 = vmatprep.subr.bf16.mxu1 %v3126_v29  ;;  %v3204_v27 = vld [vmem:[#allocation8 + $0x314] ss:$24 sps:$4 sm:$0xff]   ;;  %v3199_v29 = vld [vmem:[#allocation8 + $0x668] ss:$24 sps:$4 sm:$0xff]  }
 0x1a8   :  { %2283 = vmatpush1.bf16.msra.mxu0 %v3121_v30  ;;  %2361 = vmatpush1.bf16.msra.mxu1 %v3124_v32  ;;  %v3202_v30 = vld [vmem:[#allocation8 + $0x310] ss:$24 sps:$4 sm:$0xff]   ;;  %v3207_v32 = vld [vmem:[#allocation8 + $0x69c] ss:$24 sps:$4 sm:$0xff]  }
 0x1a9   :  { %2284 = vmatprep.subr.bf16.mxu0 %v3129_v33  ;;  %2362 = vmatprep.subr.bf16.mxu1 %v3132_v36  ;;  %v3210_v33 = vld [vmem:[#allocation8 + $0x344] ss:$24 sps:$4 sm:$0xff]   ;;  %v3205_v36 = vld [vmem:[#allocation8 + $0x698] ss:$24 sps:$4 sm:$0xff]  }
 0x1ac   :  { %2285 = vmatpush1.bf16.msra.mxu0 %v3127_v34  ;;  %2363 = vmatpush1.bf16.msra.mxu1 %v3130_v35  ;;  %v3208_v34 = vld [vmem:[#allocation8 + $0x340] ss:$24 sps:$4 sm:$0xff]   ;;  %v3213_v35 = vld [vmem:[#allocation8 + $0x6cc] ss:$24 sps:$4 sm:$0xff]  }
 0x1ad   :  { %2286 = vmatprep.subr.bf16.mxu0 %v3135_v37  ;;  %2364 = vmatprep.subr.bf16.mxu1 %v3138_v38  ;;  %v3216_v37 = vld [vmem:[#allocation8 + $0x374] ss:$24 sps:$4 sm:$0xff]   ;;  %v3211_v38 = vld [vmem:[#allocation8 + $0x6c8] ss:$24 sps:$4 sm:$0xff]  }
 0x1b0   :  { %2287 = vmatpush1.bf16.msra.mxu0 %v3133_v40  ;;  %2365 = vmatpush1.bf16.msra.mxu1 %v3136_v41  ;;  %v3214_v40 = vld [vmem:[#allocation8 + $0x370] ss:$24 sps:$4 sm:$0xff]   ;;  %v3219_v41 = vld [vmem:[#allocation8 + $0x6fc] ss:$24 sps:$4 sm:$0xff]  }
 0x1b1   :  { %2288 = vmatprep.subr.bf16.mxu0 %v3141_v42  ;;  %2366 = vmatprep.subr.bf16.mxu1 %v3144_v43  ;;  %v3222_v42 = vld [vmem:[#allocation8 + $0x3a4] ss:$24 sps:$4 sm:$0xff]   ;;  %v3220_v43 = vld [vmem:[#allocation8 + $0x3a0] ss:$24 sps:$4 sm:$0xff]  }
 0x1b4   :  { %2289 = vmatpush1.bf16.msra.mxu0 %v3139_v44  ;;  %2367 = vmatpush1.bf16.msra.mxu1 %v3142_v45  ;;  %v3225_v44 = vld [vmem:[#allocation8 + $0x72c] ss:$24 sps:$4 sm:$0xff]   ;;  %v3223_v45 = vld [vmem:[#allocation8 + $0x728] ss:$24 sps:$4 sm:$0xff]  }
 0x1b5   :  { %2290 = vmatprep.subr.bf16.mxu0 %v3147_v46  ;;  %2368 = vmatprep.subr.bf16.mxu1 %v3150_v48  ;;  %v3226_v46 = vld [vmem:[#allocation8 + $0x3d0] ss:$24 sps:$4 sm:$0xff]   ;;  %v3231_v48 = vld [vmem:[#allocation8 + $0x75c] ss:$24 sps:$4 sm:$0xff]  }
 0x1b8   :  { %2291 = vmatpush1.bf16.msra.mxu0 %v3145_v49  ;;  %2369 = vmatpush1.bf16.msra.mxu1 %v3148_v50  ;;  %v3234_v49 = vld [vmem:[#allocation8 + $0x404] ss:$24 sps:$4 sm:$0xff]   ;;  %v3229_v50 = vld [vmem:[#allocation8 + $0x758] ss:$24 sps:$4 sm:$0xff]  }
 0x1b9   :  { %2292 = vmatprep.subr.bf16.mxu0 %v3153_v51  ;;  %2370 = vmatprep.subr.bf16.mxu1 %v3156_v53  ;;  %v3232_v51 = vld [vmem:[#allocation8 + $0x400] ss:$24 sps:$4 sm:$0xff]   ;;  %v3237_v53 = vld [vmem:[#allocation8 + $0x78c] ss:$24 sps:$4 sm:$0xff]  }
 0x1bc   :  { %2293 = vmatpush1.bf16.msra.mxu0 %v3151_v54  ;;  %2371 = vmatpush1.bf16.msra.mxu1 %v3154_v55  ;;  %v3240_v54 = vld [vmem:[#allocation8 + $0x434] ss:$24 sps:$4 sm:$0xff]   ;;  %v3235_v55 = vld [vmem:[#allocation8 + $0x788] ss:$24 sps:$4 sm:$0xff]  }
 0x1bd   :  { %2294 = vmatprep.subr.bf16.mxu0 %v3159_v58  ;;  %2372 = vmatprep.subr.bf16.mxu1 %v3162_v60  ;;  %v3238_v58 = vld [vmem:[#allocation8 + $0x430] ss:$24 sps:$4 sm:$0xff]   ;;  %v3243_v60 = vld [vmem:[#allocation8 + $0x7bc] ss:$24 sps:$4 sm:$0xff]  }
 0x1c0   :  { %2295 = vmatpush1.bf16.msra.mxu0 %v3157_v61  ;;  %2373 = vmatpush1.bf16.msra.mxu1 %v3160_v62  ;;  %v3246_v61 = vld [vmem:[#allocation8 + $0x464] ss:$24 sps:$4 sm:$0xff]   ;;  %v3241_v62 = vld [vmem:[#allocation8 + $0x7b8] ss:$24 sps:$4 sm:$0xff]  }
 0x1c1   :  { %2296 = vmatprep.subr.bf16.mxu0 %v3165_v63  ;;  %2374 = vmatprep.subr.bf16.mxu1 %v3168_v0  ;;  %v3244_v63 = vld [vmem:[#allocation8 + $0x460] ss:$24 sps:$4 sm:$0xff]   ;;  %v3249_v0 = vld [vmem:[#allocation8 + $0x7ec] ss:$24 sps:$4 sm:$0xff]  }
 0x1c4   :  { %2297 = vmatpush1.bf16.msra.mxu0 %v3163_v1  ;;  %2375 = vmatpush1.bf16.msra.mxu1 %v3166_v2  ;;  %v3252_v1 = vld [vmem:[#allocation8 + $0x494] ss:$24 sps:$4 sm:$0xff]   ;;  %v3247_v2 = vld [vmem:[#allocation8 + $0x7e8] ss:$24 sps:$4 sm:$0xff]  }
 0x1c5   :  { %2298 = vmatprep.subr.bf16.mxu0 %v3171_v19  ;;  %2376 = vmatprep.subr.bf16.mxu1 %v3174_v3  ;;  %v3250_v19 = vld [vmem:[#allocation8 + $0x490] ss:$24 sps:$4 sm:$0xff]   ;;  %v3255_v3 = vld [vmem:[#allocation8 + $0x81c] ss:$24 sps:$4 sm:$0xff]  }
 0x1c8   :  { %2299 = vmatpush1.bf16.msra.mxu0 %v3169_v4  ;;  %2377 = vmatpush1.bf16.msra.mxu1 %v3172_v5  ;;  %v3258_v4 = vld [vmem:[#allocation8 + $0x4c4] ss:$24 sps:$4 sm:$0xff]   ;;  %v3253_v5 = vld [vmem:[#allocation8 + $0x818] ss:$24 sps:$4 sm:$0xff]  }
 0x1c9   :  { %2300 = vmatprep.subr.bf16.mxu0 %v3177_v6  ;;  %2378 = vmatprep.subr.bf16.mxu1 %v3180_v8  ;;  %v3256_v6 = vld [vmem:[#allocation8 + $0x4c0] ss:$24 sps:$4 sm:$0xff]   ;;  %v3261_v8 = vld [vmem:[#allocation8 + $0x84c] ss:$24 sps:$4 sm:$0xff]  }
 0x1cc   :  { %2301 = vmatpush1.bf16.msra.mxu0 %v3175_v9  ;;  %2379 = vmatpush1.bf16.msra.mxu1 %v3178_v21  ;;  %v3264_v9 = vld [vmem:[#allocation8 + $0x4f4] ss:$24 sps:$4 sm:$0xff]   ;;  %v3259_v21 = vld [vmem:[#allocation8 + $0x848] ss:$24 sps:$4 sm:$0xff]  }
 0x1cd   :  { %2302 = vmatprep.subr.bf16.mxu0 %v3183_v10  ;;  %2380 = vmatprep.subr.bf16.mxu1 %v3186_v11  ;;  %v3262_v10 = vld [vmem:[#allocation8 + $0x4f0] ss:$24 sps:$4 sm:$0xff]   ;;  %v3267_v11 = vld [vmem:[#allocation8 + $0x87c] ss:$24 sps:$4 sm:$0xff]  }
 0x1d0   :  { %2303 = vmatpush1.bf16.msra.mxu0 %v3181_v59  ;;  %2381 = vmatpush1.bf16.msra.mxu1 %v3184_v13  ;;  %v3270_v59 = vld [vmem:[#allocation8 + $0x524] ss:$24 sps:$4 sm:$0xff]   ;;  %v3265_v13 = vld [vmem:[#allocation8 + $0x878] ss:$24 sps:$4 sm:$0xff]  }
 0x1d1   :  { %2313 = vmatprep.subr.bf16.mxu0 %v3189_v14  ;;  %2382 = vmatprep.subr.bf16.mxu1 %v3192_v15  ;;  %v3268_v14 = vld [vmem:[#allocation8 + $0x520] ss:$24 sps:$4 sm:$0xff]   ;;  %v3273_v15 = vld [vmem:[#allocation8 + $0x8ac] ss:$24 sps:$4 sm:$0xff]  }
 0x1d3   :  { %2305 = vmatmul.mubr.bf16.vlgmr.msra.gmra.mrb[16].mxu0 %v3642_v56 }
 0x1d4   :  { %2314 = vmatpush1.bf16.msra.mxu0 %v3187_v16  ;;  %2345 = vmatprep.mubr.bf16.mxu0 %v3648_v7  ;;  %v3276_v16 = vld [vmem:[#allocation8 + $0x554] ss:$24 sps:$4 sm:$0xff]  }
 0x1d5   :  { %2383 = vmatpush1.bf16.msra.mxu1 %v3190_v17  ;;  %2315 = vmatprep.subr.bf16.mxu0 %v3195_v18  ;;  %v3271_v17 = vld [vmem:[#allocation8 + $0x8a8] ss:$24 sps:$4 sm:$0xff]  }
 0x1d6   :  { %2384 = vmatprep.subr.bf16.mxu1 %v3198_v23  ;;  %v3274_v18 = vld [vmem:[#allocation8 + $0x550] ss:$24 sps:$4 sm:$0xff]   ;;  %v3279_v23 = vld [vmem:[#allocation8 + $0x8dc] ss:$24 sps:$4 sm:$0xff]  }
 0x1d8   :  { %2316 = vmatpush1.bf16.msra.mxu0 %v3193_v24  ;;  %v3282_v24 = vld [vmem:[#allocation8 + $0x584] ss:$24 sps:$4 sm:$0xff]  }
 0x1d9   :  { %2385 = vmatpush1.bf16.msra.mxu1 %v3196_v25  ;;  %2317 = vmatprep.subr.bf16.mxu0 %v3201_v26  ;;  %v3277_v25 = vld [vmem:[#allocation8 + $0x8d8] ss:$24 sps:$4 sm:$0xff]  }
 0x1da   :  { %2395 = vmatprep.subr.bf16.mxu1 %v3204_v27  ;;  %v3280_v26 = vld [vmem:[#allocation8 + $0x580] ss:$24 sps:$4 sm:$0xff]   ;;  %v3285_v27 = vld [vmem:[#allocation8 + $0x5b4] ss:$24 sps:$4 sm:$0xff]  }
 0x1dc   :  { %2387 = vmatmul.mubr.bf16.vlgmr.msra.gmra.mrb[4].mxu1 %v3630_v39  ;;  %2318 = vmatpush1.bf16.msra.mxu0 %v3199_v29  ;;  %v3217_v39 = vld [vmem:[#allocation8 + $0x6f8] ss:$24 sps:$4 sm:$0xff]  }
 0x1dd   :  { %2396 = vmatpush1.bf16.msra.mxu1 %v3202_v30  ;;  %2427 = vmatprep.mubr.bf16.mxu1 %v3638_v52  ;;  %v3228_v52 = vld [vmem:[#allocation8 + $0x3d4] ss:$24 sps:$4 sm:$0xff]   ;;  %v3283_v29 = vld [vmem:[#allocation8 + $0x5b0] ss:$24 sps:$4 sm:$0xff]   ;;  %v3288_v30 = vld [vmem:[#allocation8 + $0x5e4] ss:$24 sps:$4 sm:$0xff]  }
 0x1de   :  { %2319 = vmatprep.subr.bf16.mxu0 %v3207_v32  ;;  %2397 = vmatprep.subr.bf16.mxu1 %v3210_v33  ;;  %v3286_v32 = vld [vmem:[#allocation8 + $0x5e0] ss:$24 sps:$4 sm:$0xff]   ;;  %v3291_v33 = vld [vmem:[#allocation8 + $0x614] ss:$24 sps:$4 sm:$0xff]  }
 0x1e0   :  { %2320 = vmatpush1.bf16.msra.mxu0 %v3205_v36  ;;  %v3289_v36 = vld [vmem:[#allocation8 + $0x610] ss:$24 sps:$4 sm:$0xff]  }
 0x1e1   :  { %2398 = vmatpush1.bf16.msra.mxu1 %v3208_v34  ;;  %2321 = vmatprep.subr.bf16.mxu0 %v3213_v35  ;;  %v3294_v34 = vld [vmem:[#allocation8 + $0x644] ss:$24 sps:$4 sm:$0xff]   ;;  %v3292_v35 = vld [vmem:[#allocation8 + $0x640] ss:$24 sps:$4 sm:$0xff]  }
 0x1e2   :  { %2399 = vmatprep.subr.bf16.mxu1 %v3216_v37  ;;  %v3297_v37 = vld [vmem:[#allocation8 + $0x674] ss:$24 sps:$4 sm:$0xff]  }
 0x1e4   :  { %2322 = vmatpush1.bf16.msra.mxu0 %v3211_v38  ;;  %v3295_v38 = vld [vmem:[#allocation8 + $0x670] ss:$24 sps:$4 sm:$0xff]  }
 0x1e5   :  { %2400 = vmatpush1.bf16.msra.mxu1 %v3214_v40  ;;  %2323 = vmatprep.subr.bf16.mxu0 %v3219_v41  ;;  %v3300_v40 = vld [vmem:[#allocation8 + $0x6a4] ss:$24 sps:$4 sm:$0xff]   ;;  %v3298_v41 = vld [vmem:[#allocation8 + $0x6a0] ss:$24 sps:$4 sm:$0xff]  }
 0x1e6   :  { %2401 = vmatprep.subr.bf16.mxu1 %v3222_v42 }
 0x1e8   :  { %2324 = vmatpush1.bf16.msra.mxu0 %v3217_v39  ;;  %v3303_v39 = vld [vmem:[#allocation8 + $0x6d4] ss:$24 sps:$4 sm:$0xff]  }
 0x1e9   :  { %2402 = vmatpush1.bf16.msra.mxu1 %v3220_v43  ;;  %2325 = vmatprep.subr.bf16.mxu0 %v3225_v44 }
 0x1ea   :  { %2403 = vmatprep.subr.bf16.mxu1 %v3228_v52 }
 0x1ec   :  { %2326 = vmatpush1.bf16.msra.mxu0 %v3223_v45  ;;  %v3306_v45 = vld [vmem:[#allocation8 + $0x704] ss:$24 sps:$4 sm:$0xff]  }
 0x1ed   :  { %2404 = vmatpush1.bf16.msra.mxu1 %v3226_v46  ;;  %2327 = vmatprep.subr.bf16.mxu0 %v3231_v48  ;;  %v3309_v46 = vld [vmem:[#allocation8 + $0x734] ss:$24 sps:$4 sm:$0xff]   ;;  %v3307_v48 = vld [vmem:[#allocation8 + $0x730] ss:$24 sps:$4 sm:$0xff]  }
 0x1ee   :  { %2405 = vmatprep.subr.bf16.mxu1 %v3234_v49  ;;  %v3312_v49 = vld [vmem:[#allocation8 + $0x764] ss:$24 sps:$4 sm:$0xff]  }
 0x1f0   :  { %2328 = vmatpush1.bf16.msra.mxu0 %v3229_v50  ;;  %v3310_v50 = vld [vmem:[#allocation8 + $0x760] ss:$24 sps:$4 sm:$0xff]  }
 0x1f1   :  { %2406 = vmatpush1.bf16.msra.mxu1 %v3232_v51  ;;  %2329 = vmatprep.subr.bf16.mxu0 %v3237_v53  ;;  %v3315_v51 = vld [vmem:[#allocation8 + $0x794] ss:$24 sps:$4 sm:$0xff]   ;;  %v3313_v53 = vld [vmem:[#allocation8 + $0x790] ss:$24 sps:$4 sm:$0xff]  }
 0x1f2   :  { %2407 = vmatprep.subr.bf16.mxu1 %v3240_v54  ;;  %v3318_v54 = vld [vmem:[#allocation8 + $0x7c4] ss:$24 sps:$4 sm:$0xff]  }
 0x1f4   :  { %2330 = vmatpush1.bf16.msra.mxu0 %v3235_v55  ;;  %v3316_v55 = vld [vmem:[#allocation8 + $0x7c0] ss:$24 sps:$4 sm:$0xff]  }
 0x1f5   :  { %2408 = vmatpush1.bf16.msra.mxu1 %v3238_v58  ;;  %2331 = vmatprep.subr.bf16.mxu0 %v3243_v60  ;;  %v3321_v58 = vld [vmem:[#allocation8 + $0x7f4] ss:$24 sps:$4 sm:$0xff]   ;;  %v3319_v60 = vld [vmem:[#allocation8 + $0x7f0] ss:$24 sps:$4 sm:$0xff]  }
 0x1f6   :  { %2409 = vmatprep.subr.bf16.mxu1 %v3246_v61  ;;  %v3324_v61 = vld [vmem:[#allocation8 + $0x824] ss:$24 sps:$4 sm:$0xff]  }
 0x1f8   :  { %2332 = vmatpush1.bf16.msra.mxu0 %v3241_v62  ;;  %v3322_v62 = vld [vmem:[#allocation8 + $0x820] ss:$24 sps:$4 sm:$0xff]  }
 0x1f9   :  { %2410 = vmatpush1.bf16.msra.mxu1 %v3244_v63  ;;  %2333 = vmatprep.subr.bf16.mxu0 %v3249_v0  ;;  %v3327_v63 = vld [vmem:[#allocation8 + $0x854] ss:$24 sps:$4 sm:$0xff]   ;;  %v3325_v0 = vld [vmem:[#allocation8 + $0x850] ss:$24 sps:$4 sm:$0xff]  }
 0x1fa   :  { %2411 = vmatprep.subr.bf16.mxu1 %v3252_v1  ;;  %v3330_v1 = vld [vmem:[#allocation8 + $0x884] ss:$24 sps:$4 sm:$0xff]  }
 0x1fc   :  { %2334 = vmatpush1.bf16.msra.mxu0 %v3247_v2  ;;  %v3328_v2 = vld [vmem:[#allocation8 + $0x880] ss:$24 sps:$4 sm:$0xff]  }
 0x1fd   :  { %2412 = vmatpush1.bf16.msra.mxu1 %v3250_v19  ;;  %2335 = vmatprep.subr.bf16.mxu0 %v3255_v3  ;;  %v3333_v19 = vld [vmem:[#allocation8 + $0x8b4] ss:$24 sps:$4 sm:$0xff]   ;;  %v3331_v3 = vld [vmem:[#allocation8 + $0x8b0] ss:$24 sps:$4 sm:$0xff]  }
 0x1fe   :  { %2413 = vmatprep.subr.bf16.mxu1 %v3258_v4  ;;  %v3336_v4 = vld [vmem:[#allocation8 + $0x8e4] ss:$24 sps:$4 sm:$0xff]  }
 0x200   :  { %2336 = vmatpush1.bf16.msra.mxu0 %v3253_v5  ;;  %v3334_v5 = vld [vmem:[#allocation8 + $0x8e0] ss:$24 sps:$4 sm:$0xff]  }
 0x201   :  { %2414 = vmatpush1.bf16.msra.mxu1 %v3256_v6  ;;  %2337 = vmatprep.subr.bf16.mxu0 %v3261_v8  ;;  %v636_v6 = vld [vmem:[#allocation10] sm:$0x3f] }
 0x202   :  { %2415 = vmatprep.subr.bf16.mxu1 %v3264_v9  ;;  %v641_v8 = vrot.slane %v636_v6, %v3607_v20  ;;  %v645_v9 = vrot.slane %v636_v6, %v3612_v22 }
 0x204   :  { %2338 = vmatpush1.bf16.msra.mxu0 %v3259_v21  ;;  %v2483_v21 = vld [vmem:[#allocation11] sm:$0x3f] }
 0x205   :  { %2416 = vmatpush1.bf16.msra.mxu1 %v3262_v10  ;;  %2339 = vmatprep.subr.bf16.mxu0 %v3267_v11 }
 0x206   :  { %2417 = vmatprep.subr.bf16.mxu1 %v3270_v59 }
 0x208   :  { %2340 = vmatpush1.bf16.msra.mxu0 %v3265_v13 }
 0x209   :  { %2418 = vmatpush1.bf16.msra.mxu1 %v3268_v14  ;;  %2341 = vmatprep.subr.bf16.mxu0 %v3273_v15  ;;  %v2488_v14 = vrot.slane %v2483_v21, %v3607_v20 }
 0x20a   :  { %2419 = vmatprep.subr.bf16.mxu1 %v3276_v16 }
 0x20c   :  { %2342 = vmatpush1.bf16.msra.mxu0 %v3271_v17  ;;  %v2492_v17 = vrot.slane %v2483_v21, %v3612_v22 }
 0x20d   :  { %2420 = vmatpush1.bf16.msra.mxu1 %v3274_v18  ;;  %2343 = vmatprep.subr.bf16.mxu0 %v3279_v23 }
 0x20e   :  { %2421 = vmatprep.subr.bf16.mxu1 %v3282_v24 }
 0x210   :  { %2344 = vmatpush1.bf16.msra.mxu0 %v3277_v25 }
 0x211   :  { %2422 = vmatpush1.bf16.msra.mxu1 %v3280_v26 }
 0x212   :  { %2423 = vmatprep.subr.bf16.mxu1 %v3285_v27 }
 0x213   :  { %2346 = vmatmul.mubr.bf16.vlgmr.msra.gmra.mrb[16].mxu0 %v3659_v12 }
 0x215   :  { %2424 = vmatpush1.bf16.msra.mxu1 %v3283_v29  ;;  %v649_v29 = vrot.slane %v636_v6, %v3619_v28 }
 0x216   :  { %2425 = vmatprep.subr.bf16.mxu1 %v3288_v30  ;;  %v653_v30 = vrot.slane %v636_v6, %v3622_v31 }
 0x219   :  { %2426 = vmatpush1.bf16.msra.mxu1 %v3286_v32 }
 0x21a   :  { %2436 = vmatprep.subr.bf16.mxu1 %v3291_v33 }
 0x21c   :  { %2428 = vmatmul.mubr.bf16.vlgmr.msra.gmra.mrb[4].mxu1 %v3642_v56  ;;  %v3301_v56 = vld [vmem:[#allocation8 + $0x6d0] ss:$24 sps:$4 sm:$0xff]  }
 0x21d   :  { %2437 = vmatpush1.bf16.msra.mxu1 %v3289_v36  ;;  %2468 = vmatprep.mubr.bf16.mxu1 %v3648_v7  ;;  %v3304_v7 = vld [vmem:[#allocation8 + $0x700] ss:$24 sps:$4 sm:$0xff]   ;;  %v2496_v36 = vrot.slane %v2483_v21, %v3619_v28  ;;  %v2504_v28 = vrot.slane %v2483_v21, %v3652_v57 }
 0x21e   :  { %2438 = vmatprep.subr.bf16.mxu1 %v3294_v34 }
 0x221   :  { %2439 = vmatpush1.bf16.msra.mxu1 %v3292_v35  ;;  %v2500_v35 = vrot.slane %v2483_v21, %v3622_v31  ;;  %v2508_v31 = vrot.slane %v2483_v21, %v3636_v47 }
 0x222   :  { %2440 = vmatprep.subr.bf16.mxu1 %v3297_v37 }
 0x225   :  { %2441 = vmatpush1.bf16.msra.mxu1 %v3295_v38 }
 0x226   :  { %v2142_v42 = vpop.f32.mrb[12].mxu0  ;;  %2442 = vmatprep.subr.bf16.mxu1 %v3300_v40 }
 0x227   :  { %v2144_v43 = vpop.f32.mrb[13].mxu0  ;;  %v2143_v10 = vadd.f32 %v2142_v42, %v641_v8 }
 0x228   :  { %v2146_v44 = vpop.f32.mrb[14].mxu0  ;;  %v2145_v11 = vadd.f32 %v2144_v43, %v645_v9 }
 0x229   :  { %2443 = vmatpush1.bf16.msra.mxu1 %v3298_v41  ;;  %v2147_v52 = vpop.f32.mrb[15].mxu0  ;;  %v657_v44 = vrot.slane %v636_v6, %v3652_v57 }
 0x22a   :  { %2444 = vmatprep.subr.bf16.mxu1 %v3303_v39  ;;  %v661_v52 = vrot.slane %v636_v6, %v3636_v47 }
 0x22d   :  { %2445 = vmatpush1.bf16.msra.mxu1 %v3301_v56 }
 0x22e   :  { %2446 = vmatprep.subr.bf16.mxu1 %v3306_v45 }
 0x231   :  { %2447 = vmatpush1.bf16.msra.mxu1 %v3304_v7 }
 0x232   :  { %2448 = vmatprep.subr.bf16.mxu1 %v3309_v46 }
 0x235   :  { %2449 = vmatpush1.bf16.msra.mxu1 %v3307_v48 }
 0x236   :  { %2450 = vmatprep.subr.bf16.mxu1 %v3312_v49 }
 0x239   :  { %2451 = vmatpush1.bf16.msra.mxu1 %v3310_v50 }
 0x23a   :  { %2452 = vmatprep.subr.bf16.mxu1 %v3315_v51 }
 0x23d   :  { %2453 = vmatpush1.bf16.msra.mxu1 %v3313_v53 }
 0x23e   :  { %2454 = vmatprep.subr.bf16.mxu1 %v3318_v54 }
 0x241   :  { %2455 = vmatpush1.bf16.msra.mxu1 %v3316_v55 }
 0x242   :  { %2456 = vmatprep.subr.bf16.mxu1 %v3321_v58 }
 0x245   :  { %2457 = vmatpush1.bf16.msra.mxu1 %v3319_v60  ;;  %v2849_v60 = vld [vmem:[#allocation2] ss:$0 sm:$0xff] }
 0x246   :  { %2458 = vmatprep.subr.bf16.mxu1 %v3324_v61 }
 0x249   :  { %2459 = vmatpush1.bf16.msra.mxu1 %v3322_v62 }
 0x24a   :  { %2460 = vmatprep.subr.bf16.mxu1 %v3327_v63 }
 0x24d   :  { %2461 = vmatpush1.bf16.msra.mxu1 %v3325_v0 }
 0x24e   :  { %2462 = vmatprep.subr.bf16.mxu1 %v3330_v1 }
 0x251   :  { %2463 = vmatpush1.bf16.msra.mxu1 %v3328_v2 }
 0x252   :  { %2464 = vmatprep.subr.bf16.mxu1 %v3333_v19 }
 0x255   :  { %2465 = vmatpush1.bf16.msra.mxu1 %v3331_v3 }
 0x256   :  { %2466 = vmatprep.subr.bf16.mxu1 %v3336_v4 }
 0x259   :  { %2467 = vmatpush1.bf16.msra.mxu1 %v3334_v5 }
 0x25c   :  { %2469 = vmatmul.mubr.bf16.vlgmr.msra.gmra.mrb[4].mxu1 %v3659_v12 }
 0x26e   :  { %v2224_v59 = vpop.f32.mrb[0].mxu1 }
 0x26f   :  { %v2851_v13 = vadd.f32 %v2224_v59, %v2143_v10  ;;  %v2226_v15 = vpop.f32.mrb[1].mxu1 }
 0x270   :  { %v2853_v16 = vadd.f32 %v2226_v15, %v2145_v11  ;;  %v2228_v18 = vpop.f32.mrb[2].mxu1 }
 0x271   :  { %v2477_v23 = vmax.f32 %v2851_v13, 0.0  ;;  %v2229_v24 = vpop.f32.mrb[3].mxu1 }
 0x272   :  { %v2478_v12 = vmax.f32 %v2853_v16, 0.0 }
 0x273   :  { %v2515_v25 = vmul.f32 %v2488_v14, %v2477_v23 }
 0x274   :  { %v2516_v26 = vmul.f32 %v2492_v17, %v2478_v12 }
 0x276   :  { %v2521_v27 = vadd.f32 %v2516_v26, %v2515_v25 }
 0x2e6   :  { %v2347_v32 = vpop.f32.mrb[16].mxu0 }
 0x2e7   :  { %v2854_v33 = vadd.f32 %v2347_v32, %v649_v29  ;;  %v2349_v20 = vpop.f32.mrb[17].mxu0 }
 0x2e8   :  { %v2855_v34 = vadd.f32 %v2349_v20, %v653_v30  ;;  %v2351_v22 = vpop.f32.mrb[18].mxu0 }
 0x2e9   :  { %v2479_v37 = vmax.f32 %v2854_v33, 0.0  ;;  %v2352_v38 = vpop.f32.mrb[19].mxu0 }
 0x2ea   :  { %v2480_v40 = vmax.f32 %v2855_v34, 0.0 }
 0x2eb   :  { %v2517_v41 = vmul.f32 %v2496_v36, %v2479_v37 }
 0x2ec   :  { %v2518_v42 = vmul.f32 %v2500_v35, %v2480_v40 }
 0x2ed   :  { %v2522_v39 = vadd.f32 %v2521_v27, %v2517_v41 }
 0x2ef   :  { %v2523_v43 = vadd.f32 %v2522_v39, %v2518_v42 }
 0x32f   :  { %v2470_v56 = vpop.f32.mrb[4].mxu1 }
 0x330   :  { %v2856_v45 = vadd.f32 %v2470_v56, %v657_v44  ;;  %v2472_v7 = vpop.f32.mrb[5].mxu1 }
 0x331   :  { %v2857_v46 = vadd.f32 %v2472_v7, %v661_v52  ;;  %v2474_v48 = vpop.f32.mrb[6].mxu1 }
 0x332   :  { %v2481_v49 = vmax.f32 %v2856_v45, 0.0  ;;  %v2475_v50 = vpop.f32.mrb[7].mxu1 }
 0x333   :  { %v2482_v51 = vmax.f32 %v2857_v46, 0.0 }
 0x334   :  { %v2519_v53 = vmul.f32 %v2504_v28, %v2481_v49 }
 0x335   :  { %v2520_v54 = vmul.f32 %v2508_v31, %v2482_v51 }
 0x336   :  { %v2524_v55 = vadd.f32 %v2523_v43, %v2519_v53 }
 0x338   :  { %v2525_v58 = vadd.f32 %v2524_v55, %v2520_v54 }
 0x33a   :  { %2526 = vadd.xlane.f32.xlu0 %v2525_v58 }
 0x3c7   :  { %v2527_v61 = vpop.xlane.xlu0 %2526 }
 0x3c8   :  { %v2535_v62 = vadd.f32 %v2849_v60, %v2527_v61 }
 0x3ca   :  { %2537 = vst.msk [vmem:[%s3693_s7] sm:$0xff] %vm2536_vm1, %v2535_v62 }
 0x3cb   :  { %2542 = vsyncpa [#allocation4], 1 }
 0x3cc   :  { %2543 = vsyncpa [#allocation6], 1 }
 0x3cd   :  { %2544 = vsyncpa [#allocation9], 1 }
 0x3ce   :  { %2545 = vsyncpa [#allocation12], 1 }

</bundles_post_ra>
